<compile_context>
chip_gen: v6e
topology: v6e:2x2x1
jax: 0.10.0
libtpu: 0.0.40
codegen_flags: <defaults>
</compile_context>

<pallas_src>
import numpy as np
import jax
import jax.numpy as jnp
from jax.experimental import pallas as pl
from jax.experimental.pallas import tpu as pltpu

N_STEPS = 2  # grid size; even and >= 2 so both v7x TensorCores split the work


def make_pos_indices(size: int) -> np.ndarray:
    """The integer buffer the torch module registers as `pos_indices` (reference only)."""
    ar = np.arange(size)
    pos = np.stack(np.meshgrid(ar, ar, indexing="ij"), axis=-1).reshape(-1, 2)   # (L, 2)
    rel = pos[:, None, :] - pos[None, :, :] + (size - 1)                          # (L, L, 2)
    return (rel[..., 0] * (2 * size - 1) + rel[..., 1]).astype(np.int32)          # (L, L)


def _build_window_source(weight, size, n_steps):
    """(T, heads) table -> (n_steps, heads, size, Wpad) window source (tiny, wrapper-side).

    With rps = size // n_steps, for grid step g and local row-group r:
      src[g, h, ci, (rps-1-r)*size + j] == bias[h, (g*rps + r)*size + ci, j],  j in [0, L)
    i.e. each bias row is a contiguous, statically-offset lane window of src[g].
    """
    s = size
    T, heads = weight.shape
    rps = s // n_steps
    table = weight.reshape(2 * s - 1, 2 * s - 1, heads)
    flipped = table[::-1, ::-1, :]                      # flipped[a, b, h] = table[2s-2-a, 2s-2-b, h]
    ci = jnp.arange(s)
    cj = jnp.arange(s)
    colidx = (s - 1 - ci)[:, None] + cj[None, :]        # (s, s), values in [0, 2s-2]
    colexp = flipped[:, colidx, :]                      # (2s-1, s, s, heads) = [a, ci, cj, h]
    colexp = jnp.transpose(colexp, (3, 1, 0, 2))        # (heads, ci, a, cj)
    src_flat = colexp.reshape(heads, s, (2 * s - 1) * s)   # window axis = a*s + cj  (496 lanes)
    extent = (rps - 1) * s + s * s                      # lanes needed per grid step (368)
    wpad = ((extent + 127) // 128) * 128                # pad to a lane-tile multiple (384)
    parts = []
    for g in range(n_steps):
        base = (s - (g + 1) * rps) * s                  # smallest window start used by step g
        win = src_flat[:, :, base:base + extent]
        win = jnp.pad(win, ((0, 0), (0, 0), (0, wpad - extent)))
        parts.append(win)
    return jnp.stack(parts, axis=0)                     # (n_steps, heads, s, wpad)


def _make_kernel(size, rps):
    L = size * size

    def kernel(src_ref, o_ref):
        # src_ref: (1, heads, size, Wpad)   o_ref: (heads, rps*size, L)
        for r in range(rps):                            # static unroll: all offsets compile-time
            c0 = (rps - 1 - r) * size                   # static lane offset of this row-group
            # (heads, 16, 256) contiguous window -> sublane-aligned, lane-dense, unmasked store.
            o_ref[:, r * size:(r + 1) * size, :] = src_ref[0, :, :, c0:c0 + L]

    return kernel


def rel_pos_bias_2d(qk, pos_bias_weight, size):
    """Forward of RelPosBias2d: returns the (heads, L, L) bias, L = size**2.

    The torch module only reads qk.shape[-2:] and then ignores qk, so it is unused here.
    """
    del qk  # TODO(synk): variants that crop bias[:, :i, :j] by qk.shape[-2:] must slice the result.
    T, heads = pos_bias_weight.shape
    L = size * size
    assert T == (2 * size - 1) ** 2
    assert size % N_STEPS == 0 and (size % 8 == 0), "demo assumes size=16-style shapes"
    rps = size // N_STEPS                               # query grid-rows per step (128 rows/step)

    src = _build_window_source(pos_bias_weight.astype(jnp.float32), size, N_STEPS)
    wpad = src.shape[-1]

    return pl.pallas_call(
        _make_kernel(size, rps),
        out_shape=jax.ShapeDtypeStruct((heads, L, L), jnp.float32),
        grid=(N_STEPS,),
        in_specs=[pl.BlockSpec((1, heads, size, wpad), lambda g: (g, 0, 0, 0))],
        out_specs=pl.BlockSpec((heads, rps * size, L), lambda g: (0, g, 0)),
        compiler_params=pltpu.CompilerParams(dimension_semantics=("parallel",)),
    )(src)


if __name__ == "__main__":
    key = jax.random.PRNGKey(0)
    k1, k2 = jax.random.split(key)

    size, heads, batch = 16, 8, 2
    L = size * size                       # 256 query/key positions
    T = (2 * size - 1) ** 2               # 961 relative-position buckets

    pos_bias_weight = 0.02 * jax.random.normal(k1, (T, heads), jnp.float32)
    qk = jax.random.normal(k2, (batch, heads, L, L), jnp.float32)   # shape-only input

    fwd = jax.jit(rel_pos_bias_2d, static_argnums=(2,))
    bias = jax.block_until_ready(fwd(qk, pos_bias_weight, size))
    assert bias.shape == (heads, L, L), bias.shape

    # Pure-JAX reference of the torch forward: embedding gather + 'i j h -> h i j'.
    pos_indices = jnp.asarray(make_pos_indices(size))               # (L, L) int32
    ref = jnp.transpose(pos_bias_weight[pos_indices], (2, 0, 1))
    max_err = float(jnp.max(jnp.abs(bias - ref)))
    assert max_err < 1e-6, f"mismatch vs reference: {max_err}"      # pure copies -> exact
    print("KERNEL_OK")
</pallas_src>

<mosaic_0001>
module attributes {stable_mosaic.version = 11 : i64} {
  func.func @kernel(%arg0: i32, %arg1: memref<1x8x16x384xf32, #tpu.memory_space<vmem>>, %arg2: memref<8x128x256xf32, #tpu.memory_space<vmem>>) attributes {dimension_semantics = [#tpu.dimension_semantics<parallel>], iteration_bounds = array<i64: 2>, scalar_prefetch = 0 : i64, scratch_operands = 0 : i64, tpu.core_type = #tpu.core_type<tc>, window_params = [{transform_indices = @transform_0, window_bounds = array<i64: 1, 8, 16, 384>}, {transform_indices = @transform_1, window_bounds = array<i64: 8, 128, 256>}]} {
    %c0 = arith.constant 0 : index
    %c0_0 = arith.constant 0 : index
    %c0_1 = arith.constant 0 : index
    %c112 = arith.constant 112 : index
    %0 = vector.load %arg1[%c0, %c0_0, %c0_1, %c112] : memref<1x8x16x384xf32, #tpu.memory_space<vmem>>, vector<1x8x16x256xf32>
    %1 = vector.shape_cast %0 : vector<1x8x16x256xf32> to vector<8x16x256xf32>
    %c0_2 = arith.constant 0 : index
    %c0_3 = arith.constant 0 : index
    %c0_4 = arith.constant 0 : index
    %2 = vector.load %arg2[%c0_2, %c0_3, %c0_4] : memref<8x128x256xf32, #tpu.memory_space<vmem>>, vector<8x16x256xf32>
    tpu.vector_store %arg2[%c0_2, %c0_3, %c0_4], %1 {strides = array<i32>} : memref<8x128x256xf32, #tpu.memory_space<vmem>>, vector<8x16x256xf32>,
    %c0_5 = arith.constant 0 : index
    %c0_6 = arith.constant 0 : index
    %c0_7 = arith.constant 0 : index
    %c96 = arith.constant 96 : index
    %3 = vector.load %arg1[%c0_5, %c0_6, %c0_7, %c96] : memref<1x8x16x384xf32, #tpu.memory_space<vmem>>, vector<1x8x16x256xf32>
    %4 = vector.shape_cast %3 : vector<1x8x16x256xf32> to vector<8x16x256xf32>
    %c0_8 = arith.constant 0 : index
    %c16 = arith.constant 16 : index
    %c0_9 = arith.constant 0 : index
    %5 = vector.load %arg2[%c0_8, %c16, %c0_9] : memref<8x128x256xf32, #tpu.memory_space<vmem>>, vector<8x16x256xf32>
    tpu.vector_store %arg2[%c0_8, %c16, %c0_9], %4 {strides = array<i32>} : memref<8x128x256xf32, #tpu.memory_space<vmem>>, vector<8x16x256xf32>,
    %c0_10 = arith.constant 0 : index
    %c0_11 = arith.constant 0 : index
    %c0_12 = arith.constant 0 : index
    %c80 = arith.constant 80 : index
    %6 = vector.load %arg1[%c0_10, %c0_11, %c0_12, %c80] : memref<1x8x16x384xf32, #tpu.memory_space<vmem>>, vector<1x8x16x256xf32>
    %7 = vector.shape_cast %6 : vector<1x8x16x256xf32> to vector<8x16x256xf32>
    %c0_13 = arith.constant 0 : index
    %c32 = arith.constant 32 : index
    %c0_14 = arith.constant 0 : index
    %8 = vector.load %arg2[%c0_13, %c32, %c0_14] : memref<8x128x256xf32, #tpu.memory_space<vmem>>, vector<8x16x256xf32>
    tpu.vector_store %arg2[%c0_13, %c32, %c0_14], %7 {strides = array<i32>} : memref<8x128x256xf32, #tpu.memory_space<vmem>>, vector<8x16x256xf32>,
    %c0_15 = arith.constant 0 : index
    %c0_16 = arith.constant 0 : index
    %c0_17 = arith.constant 0 : index
    %c64 = arith.constant 64 : index
    %9 = vector.load %arg1[%c0_15, %c0_16, %c0_17, %c64] : memref<1x8x16x384xf32, #tpu.memory_space<vmem>>, vector<1x8x16x256xf32>
    %10 = vector.shape_cast %9 : vector<1x8x16x256xf32> to vector<8x16x256xf32>
    %c0_18 = arith.constant 0 : index
    %c48 = arith.constant 48 : index
    %c0_19 = arith.constant 0 : index
    %11 = vector.load %arg2[%c0_18, %c48, %c0_19] : memref<8x128x256xf32, #tpu.memory_space<vmem>>, vector<8x16x256xf32>
    tpu.vector_store %arg2[%c0_18, %c48, %c0_19], %10 {strides = array<i32>} : memref<8x128x256xf32, #tpu.memory_space<vmem>>, vector<8x16x256xf32>,
    %c0_20 = arith.constant 0 : index
    %c0_21 = arith.constant 0 : index
    %c0_22 = arith.constant 0 : index
    %c48_23 = arith.constant 48 : index
    %12 = vector.load %arg1[%c0_20, %c0_21, %c0_22, %c48_23] : memref<1x8x16x384xf32, #tpu.memory_space<vmem>>, vector<1x8x16x256xf32>
    %13 = vector.shape_cast %12 : vector<1x8x16x256xf32> to vector<8x16x256xf32>
    %c0_24 = arith.constant 0 : index
    %c64_25 = arith.constant 64 : index
    %c0_26 = arith.constant 0 : index
    %14 = vector.load %arg2[%c0_24, %c64_25, %c0_26] : memref<8x128x256xf32, #tpu.memory_space<vmem>>, vector<8x16x256xf32>
    tpu.vector_store %arg2[%c0_24, %c64_25, %c0_26], %13 {strides = array<i32>} : memref<8x128x256xf32, #tpu.memory_space<vmem>>, vector<8x16x256xf32>,
    %c0_27 = arith.constant 0 : index
    %c0_28 = arith.constant 0 : index
    %c0_29 = arith.constant 0 : index
    %c32_30 = arith.constant 32 : index
    %15 = vector.load %arg1[%c0_27, %c0_28, %c0_29, %c32_30] : memref<1x8x16x384xf32, #tpu.memory_space<vmem>>, vector<1x8x16x256xf32>
    %16 = vector.shape_cast %15 : vector<1x8x16x256xf32> to vector<8x16x256xf32>
    %c0_31 = arith.constant 0 : index
    %c80_32 = arith.constant 80 : index
    %c0_33 = arith.constant 0 : index
    %17 = vector.load %arg2[%c0_31, %c80_32, %c0_33] : memref<8x128x256xf32, #tpu.memory_space<vmem>>, vector<8x16x256xf32>
    tpu.vector_store %arg2[%c0_31, %c80_32, %c0_33], %16 {strides = array<i32>} : memref<8x128x256xf32, #tpu.memory_space<vmem>>, vector<8x16x256xf32>,
    %c0_34 = arith.constant 0 : index
    %c0_35 = arith.constant 0 : index
    %c0_36 = arith.constant 0 : index
    %c16_37 = arith.constant 16 : index
    %18 = vector.load %arg1[%c0_34, %c0_35, %c0_36, %c16_37] : memref<1x8x16x384xf32, #tpu.memory_space<vmem>>, vector<1x8x16x256xf32>
    %19 = vector.shape_cast %18 : vector<1x8x16x256xf32> to vector<8x16x256xf32>
    %c0_38 = arith.constant 0 : index
    %c96_39 = arith.constant 96 : index
    %c0_40 = arith.constant 0 : index
    %20 = vector.load %arg2[%c0_38, %c96_39, %c0_40] : memref<8x128x256xf32, #tpu.memory_space<vmem>>, vector<8x16x256xf32>
    tpu.vector_store %arg2[%c0_38, %c96_39, %c0_40], %19 {strides = array<i32>} : memref<8x128x256xf32, #tpu.memory_space<vmem>>, vector<8x16x256xf32>,
    %c0_41 = arith.constant 0 : index
    %c0_42 = arith.constant 0 : index
    %c0_43 = arith.constant 0 : index
    %c0_44 = arith.constant 0 : index
    %21 = vector.load %arg1[%c0_41, %c0_42, %c0_43, %c0_44] : memref<1x8x16x384xf32, #tpu.memory_space<vmem>>, vector<1x8x16x256xf32>
    %22 = vector.shape_cast %21 : vector<1x8x16x256xf32> to vector<8x16x256xf32>
    %c0_45 = arith.constant 0 : index
    %c112_46 = arith.constant 112 : index
    %c0_47 = arith.constant 0 : index
    %23 = vector.load %arg2[%c0_45, %c112_46, %c0_47] : memref<8x128x256xf32, #tpu.memory_space<vmem>>, vector<8x16x256xf32>
    tpu.vector_store %arg2[%c0_45, %c112_46, %c0_47], %22 {strides = array<i32>} : memref<8x128x256xf32, #tpu.memory_space<vmem>>, vector<8x16x256xf32>,
    return
  }
  func.func @transform_0(%arg0: i32) -> (i32, i32, i32, i32) {
    %c0_i32 = arith.constant 0 : i32
    %c0_i32_0 = arith.constant 0 : i32
    %c0_i32_1 = arith.constant 0 : i32
    %c0_i32_2 = arith.constant 0 : i32
    return %arg0, %c0_i32, %c0_i32_0, %c0_i32_1 : i32, i32, i32, i32
  }
  func.func @transform_1(%arg0: i32) -> (i32, i32, i32) {
    %c0_i32 = arith.constant 0 : i32
    %c0_i32_0 = arith.constant 0 : i32
    %c0_i32_1 = arith.constant 0 : i32
    return %c0_i32, %arg0, %c0_i32_0 : i32, i32, i32
  }
}

</mosaic_0001>

<bundles_post_ra>
// kernel: rel_pos_bias_2d.1
= control target key start
LH: loop header
LB: loop body
LE: loop exit
PB: predicated region body
PF: predicated region fallthrough
CT: control target
= control target key end

     0   :  { %6 = vsyncpa [#allocation3], 0  ;;  %s4089_s0 = inlined_call_operand.vmem [shape: f32[2,8,16,384], index: 0, kind: input, shape index: {}]   ;;  %s4090_s1 = inlined_call_operand.hbm [shape: f32[8,256,256], index: 1, kind: output, shape index: {}]  }
   0x1   :  { %8 = vsyncpa [#allocation3 + $0x1], 0  ;;  %s2435_s6 = smov 0   ;;  %s2437_s7 = smov 0  }
   0x2   :  { %s2439_s8 = smov 0   ;;  %s2441_s9 = smov 0  }
   0x3 LB: > { %s2456_s10 = sadd.s32 4294967295, %s2410_s9   ;;  %s2303_s11 = sadd.s32 4294967294, %s2410_s9   ;;  %s2410_s9 = sphi %s2441_s9, %s4102_s9   ;;  %s2406_s8 = sphi %s2439_s8, %s4101_s8   ;;  %s2402_s7 = sphi %s2437_s7, %s4100_s7   ;;  %s2398_s6 = sphi %s2435_s6, %s4099_s6  }
   0x4   : > { %s2460_s12 = sadd.s32 1, %s2410_s9   ;;  %s47_s13 = sadd.s32 1, %s2406_s8 }
   0x5   : > { %s44_s14 = ssub.s32 %s2410_s9, %s2460_s12  ;;  %p57_p0 = scmp.ne.s32.totalorder %s2406_s8, %s2402_s7 }
   0x6   : > { %p45_p1 = scmp.eq.s32.totalorder %s44_s14, 0  ;;  %p58_p2 = scmp.eq.s32.totalorder %s2456_s10, 1 }
   0x7   : > { %p63_p3 = scmp.ne.s32.totalorder %s2402_s7, %s2398_s6  ;;  %p64_p4 = scmp.eq.s32.totalorder %s2303_s11, 1 }
   0x8   : > { %s2471_s15 = scalar_select %p45_p1, %s2406_s8, %s47_s13  }
   0x9   : > { %p2473_p5 = por %p58_p2, %p57_p0  ;;  %p2477_p6 = por %p64_p4, %p63_p3 }
   0xa   : > { %p2306_p7 = scmp.ge.s32.totalorder %s2410_s9, 1  ;;  %p90_p8 = scmp.lt.s32.totalorder %s2410_s9, 3 }
   0xc   : > { %p91_p9 = pnand %p2306_p7, %p90_p8 }
   0xe   : > { %94 = sbr.rel (%p91_p9) target bundleno = 821 (0x335), region = 24 }
  0x13   : > { %p110_p10 = scmp.lt.s32.totalorder %s2456_s10, 1  ;;  %s2412_s23 = smov 16   ;;  %vm308_vm0 = vcmask 130048   ;;  %vm597_vm1 = vcmask 261120   ;;  %vm886_vm2 = vcmask 392192   ;;  %vm1175_vm3 = vcmask 523264  }
  0x14   : > { %s2413_s24 = smov 32   ;;  %s107_s25 = sand.u32 1, %s2402_s7   ;;  %vm1464_vm4 = vcmask 654336   ;;  %vm1753_vm5 = vcmask 785408   ;;  %vm2042_vm6 = vcmask 916480  }
  0x15   : > { %s111_s18 = scalar_select %p110_p10, %s2456_s10, 1 }
  0x16   : > { %s2307_s26 = sshll.u32 %s107_s25, 11  ;;  %s2414_s28 = smov 48  }
  0x17   : > { %s2317_s19 = smul.u32 384, %s111_s18  ;;  %s2759_s27 = scalar_lea.vmem [#allocation2], %s2307_s26 }
  0x18   : > { %s2415_s29 = smov 64   ;;  %s2416_s30 = smov 80  }
  0x19   : > { %s2488_s22 = scalar_lea.vmem %s4089_s0, %s2317_s19  ;;  %s2417_s2 = smov 96  }
  0x1a   : > { %v2491_v0 = vld [vmem:[%s2488_s22 + $0x10] sm:$0xff]  ;;  %v2494_v1 = vld [vmem:[%s2488_s22] sm:$0xff]  ;;  %v2501_v2 = vld [vmem:[%s2488_s22 + $0x18] sm:$0xff]  ;;  %s2418_s3 = smov 112   ;;  %s2204_s4 = scalar_lea.sflag [#allocation3], %s107_s25 }
  0x1b   : > { %216 = vrot.lane.b32.xlu1 %v2491_v0, %s2412_s23  ;;  %212 = vrot.lane.b32.xlu0 %v2494_v1, %s2412_s23  ;;  %v2504_v3 = vld [vmem:[%s2488_s22 + $0x8] sm:$0xff]  ;;  %v2514_v5 = vld [vmem:[%s2488_s22 + $0x20] sm:$0xff] }
  0x1c   : > { %v2511_v4 = vld [vmem:[%s2488_s22 + $0x28] sm:$0xff]  ;;  %v2521_v6 = vld [vmem:[%s2488_s22 + $0x38] sm:$0xff]  ;;  %v2524_v7 = vld [vmem:[%s2488_s22 + $0x30] sm:$0xff] }
  0x1d   : > { %v2531_v8 = vld [vmem:[%s2488_s22 + $0x48] sm:$0xff]  ;;  %v2534_v9 = vld [vmem:[%s2488_s22 + $0x40] sm:$0xff]  ;;  %v2541_v10 = vld [vmem:[%s2488_s22 + $0x58] sm:$0xff] }
  0x1e   : > { %v2544_v11 = vld [vmem:[%s2488_s22 + $0x50] sm:$0xff]  ;;  %v2551_v12 = vld [vmem:[%s2488_s22 + $0x68] sm:$0xff]  ;;  %v2554_v13 = vld [vmem:[%s2488_s22 + $0x60] sm:$0xff] }
  0x1f   : > { %218 = vrot.lane.b32.xlu1 %v2501_v2, %s2412_s23  ;;  %214 = vrot.lane.b32.xlu0 %v2504_v3, %s2412_s23  ;;  %v2561_v14 = vld [vmem:[%s2488_s22 + $0x78] sm:$0xff]  ;;  %v2564_v15 = vld [vmem:[%s2488_s22 + $0x70] sm:$0xff] }
  0x20   : > { %v2571_v16 = vld [vmem:[%s2488_s22 + $0x88] sm:$0xff]  ;;  %v2574_v17 = vld [vmem:[%s2488_s22 + $0x80] sm:$0xff]  ;;  %v2581_v18 = vld [vmem:[%s2488_s22 + $0x98] sm:$0xff] }
  0x21   : > { %v2584_v19 = vld [vmem:[%s2488_s22 + $0x90] sm:$0xff]  ;;  %v2591_v20 = vld [vmem:[%s2488_s22 + $0xa8] sm:$0xff]  ;;  %v2594_v21 = vld [vmem:[%s2488_s22 + $0xa0] sm:$0xff] }
  0x22   : > { %v2601_v22 = vld [vmem:[%s2488_s22 + $0xb8] sm:$0xff]  ;;  %v2604_v23 = vld [vmem:[%s2488_s22 + $0xb0] sm:$0xff]  ;;  %v2611_v24 = vld [vmem:[%s2488_s22 + $0xc8] sm:$0xff] }
  0x23   : > { %222 = vrot.lane.b32.xlu1 %v2511_v4, %s2412_s23  ;;  %220 = vrot.lane.b32.xlu0 %v2514_v5, %s2412_s23  ;;  %v2614_v25 = vld [vmem:[%s2488_s22 + $0xc0] sm:$0xff]  ;;  %v2621_v26 = vld [vmem:[%s2488_s22 + $0xd8] sm:$0xff] }
  0x24   : > { %v2624_v27 = vld [vmem:[%s2488_s22 + $0xd0] sm:$0xff]  ;;  %v2631_v28 = vld [vmem:[%s2488_s22 + $0xe8] sm:$0xff]  ;;  %v2634_v29 = vld [vmem:[%s2488_s22 + $0xe0] sm:$0xff] }
  0x25   : > { %v2641_v30 = vld [vmem:[%s2488_s22 + $0xf8] sm:$0xff]  ;;  %v2644_v31 = vld [vmem:[%s2488_s22 + $0xf0] sm:$0xff]  ;;  %v2651_v32 = vld [vmem:[%s2488_s22 + $0x108] sm:$0xff] }
  0x26   : > { %v2654_v33 = vld [vmem:[%s2488_s22 + $0x100] sm:$0xff]  ;;  %v2661_v34 = vld [vmem:[%s2488_s22 + $0x118] sm:$0xff]  ;;  %v2664_v35 = vld [vmem:[%s2488_s22 + $0x110] sm:$0xff] }
  0x27   : > { %226 = vrot.lane.b32.xlu1 %v2521_v6, %s2412_s23  ;;  %224 = vrot.lane.b32.xlu0 %v2524_v7, %s2412_s23  ;;  %v2671_v36 = vld [vmem:[%s2488_s22 + $0x128] sm:$0xff]  ;;  %v2674_v37 = vld [vmem:[%s2488_s22 + $0x120] sm:$0xff] }
  0x28   : > { %v2681_v38 = vld [vmem:[%s2488_s22 + $0x138] sm:$0xff]  ;;  %v2684_v39 = vld [vmem:[%s2488_s22 + $0x130] sm:$0xff]  ;;  %v2691_v40 = vld [vmem:[%s2488_s22 + $0x148] sm:$0xff] }
  0x29   : > { %v2694_v41 = vld [vmem:[%s2488_s22 + $0x140] sm:$0xff]  ;;  %v2701_v42 = vld [vmem:[%s2488_s22 + $0x158] sm:$0xff]  ;;  %v2704_v43 = vld [vmem:[%s2488_s22 + $0x150] sm:$0xff] }
  0x2a   : > { %v2711_v44 = vld [vmem:[%s2488_s22 + $0x168] sm:$0xff]  ;;  %v2714_v45 = vld [vmem:[%s2488_s22 + $0x160] sm:$0xff]  ;;  %v2721_v46 = vld [vmem:[%s2488_s22 + $0x178] sm:$0xff] }
  0x2b   : > { %230 = vrot.lane.b32.xlu1 %v2531_v8, %s2412_s23  ;;  %228 = vrot.lane.b32.xlu0 %v2534_v9, %s2412_s23  ;;  %v2724_v47 = vld [vmem:[%s2488_s22 + $0x170] sm:$0xff] }
  0x2f   : > { %234 = vrot.lane.b32.xlu1 %v2541_v10, %s2412_s23  ;;  %232 = vrot.lane.b32.xlu0 %v2544_v11, %s2412_s23 }
  0x33   : > { %238 = vrot.lane.b32.xlu1 %v2551_v12, %s2412_s23  ;;  %236 = vrot.lane.b32.xlu0 %v2554_v13, %s2412_s23 }
  0x37   : > { %242 = vrot.lane.b32.xlu1 %v2561_v14, %s2412_s23  ;;  %240 = vrot.lane.b32.xlu0 %v2564_v15, %s2412_s23 }
  0x3b   : > { %246 = vrot.lane.b32.xlu1 %v2571_v16, %s2412_s23  ;;  %244 = vrot.lane.b32.xlu0 %v2574_v17, %s2412_s23 }
  0x3f   : > { %250 = vrot.lane.b32.xlu1 %v2581_v18, %s2412_s23  ;;  %248 = vrot.lane.b32.xlu0 %v2584_v19, %s2412_s23 }
  0x43   : > { %254 = vrot.lane.b32.xlu1 %v2591_v20, %s2412_s23  ;;  %252 = vrot.lane.b32.xlu0 %v2594_v21, %s2412_s23 }
  0x47   : > { %258 = vrot.lane.b32.xlu1 %v2601_v22, %s2412_s23  ;;  %256 = vrot.lane.b32.xlu0 %v2604_v23, %s2412_s23 }
  0x4b   : > { %262 = vrot.lane.b32.xlu1 %v2611_v24, %s2412_s23  ;;  %260 = vrot.lane.b32.xlu0 %v2614_v25, %s2412_s23 }
  0x4f   : > { %266 = vrot.lane.b32.xlu1 %v2621_v26, %s2412_s23  ;;  %264 = vrot.lane.b32.xlu0 %v2624_v27, %s2412_s23 }
  0x53   : > { %270 = vrot.lane.b32.xlu1 %v2631_v28, %s2412_s23  ;;  %268 = vrot.lane.b32.xlu0 %v2634_v29, %s2412_s23 }
  0x57   : > { %274 = vrot.lane.b32.xlu1 %v2641_v30, %s2412_s23  ;;  %272 = vrot.lane.b32.xlu0 %v2644_v31, %s2412_s23 }
  0x5b   : > { %278 = vrot.lane.b32.xlu1 %v2651_v32, %s2412_s23  ;;  %276 = vrot.lane.b32.xlu0 %v2654_v33, %s2412_s23 }
  0x5f   : > { %282 = vrot.lane.b32.xlu1 %v2661_v34, %s2412_s23  ;;  %280 = vrot.lane.b32.xlu0 %v2664_v35, %s2412_s23 }
  0x63   : > { %286 = vrot.lane.b32.xlu1 %v2671_v36, %s2412_s23  ;;  %284 = vrot.lane.b32.xlu0 %v2674_v37, %s2412_s23 }
  0x67   : > { %290 = vrot.lane.b32.xlu1 %v2681_v38, %s2412_s23  ;;  %288 = vrot.lane.b32.xlu0 %v2684_v39, %s2412_s23 }
  0x6b   : > { %294 = vrot.lane.b32.xlu1 %v2691_v40, %s2412_s23  ;;  %292 = vrot.lane.b32.xlu0 %v2694_v41, %s2412_s23 }
  0x6f   : > { %298 = vrot.lane.b32.xlu1 %v2701_v42, %s2412_s23  ;;  %296 = vrot.lane.b32.xlu0 %v2704_v43, %s2412_s23 }
  0x73   : > { %302 = vrot.lane.b32.xlu1 %v2711_v44, %s2412_s23  ;;  %300 = vrot.lane.b32.xlu0 %v2714_v45, %s2412_s23 }
  0x77   : > { %306 = vrot.lane.b32.xlu1 %v2721_v46, %s2412_s23  ;;  %304 = vrot.lane.b32.xlu0 %v2724_v47, %s2412_s23 }
  0x7b   : > { %503 = vrot.lane.b32.xlu1 %v2504_v3, %s2413_s24  ;;  %501 = vrot.lane.b32.xlu0 %v2494_v1, %s2413_s24 }
  0x7f   : > { %507 = vrot.lane.b32.xlu1 %v2501_v2, %s2413_s24  ;;  %505 = vrot.lane.b32.xlu0 %v2491_v0, %s2413_s24 }
  0x83   : > { %511 = vrot.lane.b32.xlu1 %v2511_v4, %s2413_s24  ;;  %509 = vrot.lane.b32.xlu0 %v2514_v5, %s2413_s24 }
  0x87   : > { %515 = vrot.lane.b32.xlu1 %v2521_v6, %s2413_s24  ;;  %513 = vrot.lane.b32.xlu0 %v2524_v7, %s2413_s24 }
  0x8b   : > { %519 = vrot.lane.b32.xlu1 %v2531_v8, %s2413_s24  ;;  %517 = vrot.lane.b32.xlu0 %v2534_v9, %s2413_s24 }
  0x8d   : > { %v217_v48 = vpop.permute.xlu1 %216  ;;  %v213_v49 = vpop.permute.xlu0 %212 }
  0x8f   : > { %523 = vrot.lane.b32.xlu1 %v2541_v10, %s2413_s24  ;;  %521 = vrot.lane.b32.xlu0 %v2544_v11, %s2413_s24 }
  0x91   : > { %v219_v50 = vpop.permute.xlu1 %218  ;;  %v215_v51 = vpop.permute.xlu0 %214 }
  0x92   : > { %v309_v52 = vsel %vm308_vm0, %v213_v49, %v215_v51  ;;  %v310_v53 = vsel %vm308_vm0, %v215_v51, %v217_v48 }
  0x93   : > { %373 = vst [vmem:[%s2759_s27] sm:$0xff] %v309_v52  ;;  %374 = vst [vmem:[%s2759_s27 + $0x8] sm:$0xff] %v310_v53  ;;  %527 = vrot.lane.b32.xlu1 %v2551_v12, %s2413_s24  ;;  %525 = vrot.lane.b32.xlu0 %v2554_v13, %s2413_s24 }
  0x95   : > { %v223_v54 = vpop.permute.xlu1 %222  ;;  %v221_v55 = vpop.permute.xlu0 %220 }
  0x96   : > { %v311_v56 = vsel %vm308_vm0, %v219_v50, %v221_v55  ;;  %v312_v57 = vsel %vm308_vm0, %v221_v55, %v223_v54 }
  0x97   : > { %375 = vst [vmem:[%s2759_s27 + $0x10] sm:$0xff] %v311_v56  ;;  %376 = vst [vmem:[%s2759_s27 + $0x18] sm:$0xff] %v312_v57  ;;  %531 = vrot.lane.b32.xlu1 %v2561_v14, %s2413_s24  ;;  %529 = vrot.lane.b32.xlu0 %v2564_v15, %s2413_s24 }
  0x99   : > { %v227_v58 = vpop.permute.xlu1 %226  ;;  %v225_v59 = vpop.permute.xlu0 %224 }
  0x9a   : > { %v313_v60 = vsel %vm308_vm0, %v225_v59, %v227_v58 }
  0x9b   : > { %377 = vst [vmem:[%s2759_s27 + $0x100] sm:$0xff] %v313_v60  ;;  %535 = vrot.lane.b32.xlu1 %v2571_v16, %s2413_s24  ;;  %533 = vrot.lane.b32.xlu0 %v2574_v17, %s2413_s24 }
  0x9d   : > { %v231_v61 = vpop.permute.xlu1 %230  ;;  %v229_v62 = vpop.permute.xlu0 %228 }
  0x9e   : > { %v314_v63 = vsel %vm308_vm0, %v227_v58, %v229_v62 }
  0x9f   : > { %378 = vst [vmem:[%s2759_s27 + $0x108] sm:$0xff] %v314_v63  ;;  %539 = vrot.lane.b32.xlu1 %v2581_v18, %s2413_s24  ;;  %537 = vrot.lane.b32.xlu0 %v2584_v19, %s2413_s24 }
  0xa1   : > { %v235_v48 = vpop.permute.xlu1 %234  ;;  %v233_v49 = vpop.permute.xlu0 %232 }
  0xa2   : > { %v315_v50 = vsel %vm308_vm0, %v231_v61, %v233_v49  ;;  %v316_v51 = vsel %vm308_vm0, %v233_v49, %v235_v48 }
  0xa3   : > { %379 = vst [vmem:[%s2759_s27 + $0x110] sm:$0xff] %v315_v50  ;;  %380 = vst [vmem:[%s2759_s27 + $0x118] sm:$0xff] %v316_v51  ;;  %543 = vrot.lane.b32.xlu1 %v2591_v20, %s2413_s24  ;;  %541 = vrot.lane.b32.xlu0 %v2594_v21, %s2413_s24 }
  0xa5   : > { %v239_v52 = vpop.permute.xlu1 %238  ;;  %v237_v53 = vpop.permute.xlu0 %236 }
  0xa6   : > { %v317_v54 = vsel %vm308_vm0, %v237_v53, %v239_v52 }
  0xa7   : > { %381 = vst [vmem:[%s2759_s27 + $0x200] sm:$0xff] %v317_v54  ;;  %547 = vrot.lane.b32.xlu1 %v2601_v22, %s2413_s24  ;;  %545 = vrot.lane.b32.xlu0 %v2604_v23, %s2413_s24 }
  0xa9   : > { %v243_v55 = vpop.permute.xlu1 %242  ;;  %v241_v56 = vpop.permute.xlu0 %240 }
  0xaa   : > { %v318_v57 = vsel %vm308_vm0, %v239_v52, %v241_v56 }
  0xab   : > { %382 = vst [vmem:[%s2759_s27 + $0x208] sm:$0xff] %v318_v57  ;;  %551 = vrot.lane.b32.xlu1 %v2611_v24, %s2413_s24  ;;  %549 = vrot.lane.b32.xlu0 %v2614_v25, %s2413_s24 }
  0xad   : > { %v247_v58 = vpop.permute.xlu1 %246  ;;  %v245_v59 = vpop.permute.xlu0 %244 }
  0xae   : > { %v319_v60 = vsel %vm308_vm0, %v243_v55, %v245_v59  ;;  %v320_v61 = vsel %vm308_vm0, %v245_v59, %v247_v58 }
  0xaf   : > { %383 = vst [vmem:[%s2759_s27 + $0x210] sm:$0xff] %v319_v60  ;;  %384 = vst [vmem:[%s2759_s27 + $0x218] sm:$0xff] %v320_v61  ;;  %555 = vrot.lane.b32.xlu1 %v2621_v26, %s2413_s24  ;;  %553 = vrot.lane.b32.xlu0 %v2624_v27, %s2413_s24 }
  0xb1   : > { %v251_v62 = vpop.permute.xlu1 %250  ;;  %v249_v63 = vpop.permute.xlu0 %248 }
  0xb2   : > { %v321_v48 = vsel %vm308_vm0, %v249_v63, %v251_v62 }
  0xb3   : > { %385 = vst [vmem:[%s2759_s27 + $0x300] sm:$0xff] %v321_v48  ;;  %559 = vrot.lane.b32.xlu1 %v2631_v28, %s2413_s24  ;;  %557 = vrot.lane.b32.xlu0 %v2634_v29, %s2413_s24 }
  0xb5   : > { %v255_v49 = vpop.permute.xlu1 %254  ;;  %v253_v50 = vpop.permute.xlu0 %252 }
  0xb6   : > { %v322_v51 = vsel %vm308_vm0, %v251_v62, %v253_v50 }
  0xb7   : > { %386 = vst [vmem:[%s2759_s27 + $0x308] sm:$0xff] %v322_v51  ;;  %563 = vrot.lane.b32.xlu1 %v2641_v30, %s2413_s24  ;;  %561 = vrot.lane.b32.xlu0 %v2644_v31, %s2413_s24 }
  0xb9   : > { %v259_v52 = vpop.permute.xlu1 %258  ;;  %v257_v53 = vpop.permute.xlu0 %256 }
  0xba   : > { %v323_v54 = vsel %vm308_vm0, %v255_v49, %v257_v53  ;;  %v324_v55 = vsel %vm308_vm0, %v257_v53, %v259_v52 }
  0xbb   : > { %387 = vst [vmem:[%s2759_s27 + $0x310] sm:$0xff] %v323_v54  ;;  %388 = vst [vmem:[%s2759_s27 + $0x318] sm:$0xff] %v324_v55  ;;  %567 = vrot.lane.b32.xlu1 %v2651_v32, %s2413_s24  ;;  %565 = vrot.lane.b32.xlu0 %v2654_v33, %s2413_s24 }
  0xbd   : > { %v263_v56 = vpop.permute.xlu1 %262  ;;  %v261_v57 = vpop.permute.xlu0 %260 }
  0xbe   : > { %v325_v58 = vsel %vm308_vm0, %v261_v57, %v263_v56 }
  0xbf   : > { %389 = vst [vmem:[%s2759_s27 + $0x400] sm:$0xff] %v325_v58  ;;  %571 = vrot.lane.b32.xlu1 %v2661_v34, %s2413_s24  ;;  %569 = vrot.lane.b32.xlu0 %v2664_v35, %s2413_s24 }
  0xc1   : > { %v267_v59 = vpop.permute.xlu1 %266  ;;  %v265_v60 = vpop.permute.xlu0 %264 }
  0xc2   : > { %v326_v61 = vsel %vm308_vm0, %v263_v56, %v265_v60 }
  0xc3   : > { %390 = vst [vmem:[%s2759_s27 + $0x408] sm:$0xff] %v326_v61  ;;  %575 = vrot.lane.b32.xlu1 %v2671_v36, %s2413_s24  ;;  %573 = vrot.lane.b32.xlu0 %v2674_v37, %s2413_s24 }
  0xc5   : > { %v271_v62 = vpop.permute.xlu1 %270  ;;  %v269_v63 = vpop.permute.xlu0 %268 }
  0xc6   : > { %v327_v48 = vsel %vm308_vm0, %v267_v59, %v269_v63  ;;  %v328_v49 = vsel %vm308_vm0, %v269_v63, %v271_v62 }
  0xc7   : > { %391 = vst [vmem:[%s2759_s27 + $0x410] sm:$0xff] %v327_v48  ;;  %392 = vst [vmem:[%s2759_s27 + $0x418] sm:$0xff] %v328_v49  ;;  %579 = vrot.lane.b32.xlu1 %v2681_v38, %s2413_s24  ;;  %577 = vrot.lane.b32.xlu0 %v2684_v39, %s2413_s24 }
  0xc9   : > { %v275_v50 = vpop.permute.xlu1 %274  ;;  %v273_v51 = vpop.permute.xlu0 %272 }
  0xca   : > { %v329_v52 = vsel %vm308_vm0, %v273_v51, %v275_v50 }
  0xcb   : > { %393 = vst [vmem:[%s2759_s27 + $0x500] sm:$0xff] %v329_v52  ;;  %583 = vrot.lane.b32.xlu1 %v2691_v40, %s2413_s24  ;;  %581 = vrot.lane.b32.xlu0 %v2694_v41, %s2413_s24 }
  0xcd   : > { %v279_v53 = vpop.permute.xlu1 %278  ;;  %v277_v54 = vpop.permute.xlu0 %276 }
  0xce   : > { %v330_v55 = vsel %vm308_vm0, %v275_v50, %v277_v54 }
  0xcf   : > { %394 = vst [vmem:[%s2759_s27 + $0x508] sm:$0xff] %v330_v55  ;;  %587 = vrot.lane.b32.xlu1 %v2701_v42, %s2413_s24  ;;  %585 = vrot.lane.b32.xlu0 %v2704_v43, %s2413_s24 }
  0xd1   : > { %v283_v56 = vpop.permute.xlu1 %282  ;;  %v281_v57 = vpop.permute.xlu0 %280 }
  0xd2   : > { %v331_v58 = vsel %vm308_vm0, %v279_v53, %v281_v57  ;;  %v332_v59 = vsel %vm308_vm0, %v281_v57, %v283_v56 }
  0xd3   : > { %395 = vst [vmem:[%s2759_s27 + $0x510] sm:$0xff] %v331_v58  ;;  %396 = vst [vmem:[%s2759_s27 + $0x518] sm:$0xff] %v332_v59  ;;  %591 = vrot.lane.b32.xlu1 %v2711_v44, %s2413_s24  ;;  %589 = vrot.lane.b32.xlu0 %v2714_v45, %s2413_s24 }
  0xd5   : > { %v287_v60 = vpop.permute.xlu1 %286  ;;  %v285_v61 = vpop.permute.xlu0 %284 }
  0xd6   : > { %v333_v62 = vsel %vm308_vm0, %v285_v61, %v287_v60 }
  0xd7   : > { %397 = vst [vmem:[%s2759_s27 + $0x600] sm:$0xff] %v333_v62  ;;  %595 = vrot.lane.b32.xlu1 %v2721_v46, %s2413_s24  ;;  %593 = vrot.lane.b32.xlu0 %v2724_v47, %s2413_s24 }
  0xd9   : > { %v291_v63 = vpop.permute.xlu1 %290  ;;  %v289_v48 = vpop.permute.xlu0 %288 }
  0xda   : > { %v334_v49 = vsel %vm308_vm0, %v287_v60, %v289_v48 }
  0xdb   : > { %398 = vst [vmem:[%s2759_s27 + $0x608] sm:$0xff] %v334_v49  ;;  %792 = vrot.lane.b32.xlu1 %v2504_v3, %s2414_s28  ;;  %790 = vrot.lane.b32.xlu0 %v2494_v1, %s2414_s28 }
  0xdd   : > { %v295_v50 = vpop.permute.xlu1 %294  ;;  %v293_v51 = vpop.permute.xlu0 %292 }
  0xde   : > { %v335_v52 = vsel %vm308_vm0, %v291_v63, %v293_v51  ;;  %v336_v53 = vsel %vm308_vm0, %v293_v51, %v295_v50 }
  0xdf   : > { %399 = vst [vmem:[%s2759_s27 + $0x610] sm:$0xff] %v335_v52  ;;  %400 = vst [vmem:[%s2759_s27 + $0x618] sm:$0xff] %v336_v53  ;;  %796 = vrot.lane.b32.xlu1 %v2501_v2, %s2414_s28  ;;  %794 = vrot.lane.b32.xlu0 %v2491_v0, %s2414_s28 }
  0xe1   : > { %v299_v54 = vpop.permute.xlu1 %298  ;;  %v297_v55 = vpop.permute.xlu0 %296 }
  0xe2   : > { %v337_v56 = vsel %vm308_vm0, %v297_v55, %v299_v54 }
  0xe3   : > { %401 = vst [vmem:[%s2759_s27 + $0x700] sm:$0xff] %v337_v56  ;;  %800 = vrot.lane.b32.xlu1 %v2511_v4, %s2414_s28  ;;  %798 = vrot.lane.b32.xlu0 %v2514_v5, %s2414_s28 }
  0xe5   : > { %v303_v57 = vpop.permute.xlu1 %302  ;;  %v301_v58 = vpop.permute.xlu0 %300 }
  0xe6   : > { %v338_v59 = vsel %vm308_vm0, %v299_v54, %v301_v58 }
  0xe7   : > { %402 = vst [vmem:[%s2759_s27 + $0x708] sm:$0xff] %v338_v59  ;;  %804 = vrot.lane.b32.xlu1 %v2521_v6, %s2414_s28  ;;  %802 = vrot.lane.b32.xlu0 %v2524_v7, %s2414_s28 }
  0xe9   : > { %v307_v0 = vpop.permute.xlu1 %306  ;;  %v305_v60 = vpop.permute.xlu0 %304 }
  0xea   : > { %v339_v61 = vsel %vm308_vm0, %v303_v57, %v305_v60  ;;  %v340_v62 = vsel %vm308_vm0, %v305_v60, %v307_v0 }
  0xeb   : > { %403 = vst [vmem:[%s2759_s27 + $0x710] sm:$0xff] %v339_v61  ;;  %404 = vst [vmem:[%s2759_s27 + $0x718] sm:$0xff] %v340_v62  ;;  %808 = vrot.lane.b32.xlu1 %v2531_v8, %s2414_s28  ;;  %806 = vrot.lane.b32.xlu0 %v2534_v9, %s2414_s28 }
  0xed   : > { %v504_v6 = vpop.permute.xlu1 %503  ;;  %v502_v63 = vpop.permute.xlu0 %501 }
  0xee   : > { %v598_v7 = vsel %vm597_vm1, %v502_v63, %v504_v6 }
  0xef   : > { %662 = vst [vmem:[%s2759_s27 + $0x20] sm:$0xff] %v598_v7  ;;  %812 = vrot.lane.b32.xlu1 %v2541_v10, %s2414_s28  ;;  %810 = vrot.lane.b32.xlu0 %v2544_v11, %s2414_s28 }
  0xf1   : > { %v508_v48 = vpop.permute.xlu1 %507  ;;  %v506_v49 = vpop.permute.xlu0 %505 }
  0xf2   : > { %v599_v8 = vsel %vm597_vm1, %v504_v6, %v506_v49 }
  0xf3   : > { %663 = vst [vmem:[%s2759_s27 + $0x28] sm:$0xff] %v599_v8  ;;  %816 = vrot.lane.b32.xlu1 %v2551_v12, %s2414_s28  ;;  %814 = vrot.lane.b32.xlu0 %v2554_v13, %s2414_s28 }
  0xf5   : > { %v512_v9 = vpop.permute.xlu1 %511  ;;  %v510_v50 = vpop.permute.xlu0 %509 }
  0xf6   : > { %v600_v10 = vsel %vm597_vm1, %v508_v48, %v510_v50  ;;  %v601_v51 = vsel %vm597_vm1, %v510_v50, %v512_v9 }
  0xf7   : > { %664 = vst [vmem:[%s2759_s27 + $0x30] sm:$0xff] %v600_v10  ;;  %665 = vst [vmem:[%s2759_s27 + $0x38] sm:$0xff] %v601_v51  ;;  %820 = vrot.lane.b32.xlu1 %v2561_v14, %s2414_s28  ;;  %818 = vrot.lane.b32.xlu0 %v2564_v15, %s2414_s28 }
  0xf9   : > { %v516_v11 = vpop.permute.xlu1 %515  ;;  %v514_v12 = vpop.permute.xlu0 %513 }
  0xfa   : > { %v602_v13 = vsel %vm597_vm1, %v514_v12, %v516_v11 }
  0xfb   : > { %666 = vst [vmem:[%s2759_s27 + $0x120] sm:$0xff] %v602_v13  ;;  %824 = vrot.lane.b32.xlu1 %v2571_v16, %s2414_s28  ;;  %822 = vrot.lane.b32.xlu0 %v2574_v17, %s2414_s28 }
  0xfd   : > { %v520_v52 = vpop.permute.xlu1 %519  ;;  %v518_v53 = vpop.permute.xlu0 %517 }
  0xfe   : > { %v603_v14 = vsel %vm597_vm1, %v516_v11, %v518_v53 }
  0xff   : > { %667 = vst [vmem:[%s2759_s27 + $0x128] sm:$0xff] %v603_v14  ;;  %828 = vrot.lane.b32.xlu1 %v2581_v18, %s2414_s28  ;;  %826 = vrot.lane.b32.xlu0 %v2584_v19, %s2414_s28 }
 0x101   : > { %v524_v15 = vpop.permute.xlu1 %523  ;;  %v522_v54 = vpop.permute.xlu0 %521 }
 0x102   : > { %v604_v16 = vsel %vm597_vm1, %v520_v52, %v522_v54  ;;  %v605_v55 = vsel %vm597_vm1, %v522_v54, %v524_v15  ;;  %v3065_v52 = vld [vmem:[%s2488_s22 + $0x38] sm:$0xff] }
 0x103   : > { %668 = vst [vmem:[%s2759_s27 + $0x130] sm:$0xff] %v604_v16  ;;  %669 = vst [vmem:[%s2759_s27 + $0x138] sm:$0xff] %v605_v55  ;;  %832 = vrot.lane.b32.xlu1 %v2591_v20, %s2414_s28  ;;  %830 = vrot.lane.b32.xlu0 %v2594_v21, %s2414_s28 }
 0x105   : > { %v528_v17 = vpop.permute.xlu1 %527  ;;  %v526_v18 = vpop.permute.xlu0 %525 }
 0x106   : > { %v606_v19 = vsel %vm597_vm1, %v526_v18, %v528_v17  ;;  %v3091_v18 = vld [vmem:[%s2488_s22 + $0x58] sm:$0xff] }
 0x107   : > { %670 = vst [vmem:[%s2759_s27 + $0x220] sm:$0xff] %v606_v19  ;;  %836 = vrot.lane.b32.xlu1 %v2601_v22, %s2414_s28  ;;  %834 = vrot.lane.b32.xlu0 %v2604_v23, %s2414_s28  ;;  %v3094_v19 = vld [vmem:[%s2488_s22 + $0x50] sm:$0xff] }
 0x109   : > { %v532_v56 = vpop.permute.xlu1 %531  ;;  %v530_v57 = vpop.permute.xlu0 %529 }
 0x10a   : > { %v607_v20 = vsel %vm597_vm1, %v528_v17, %v530_v57 }
 0x10b   : > { %671 = vst [vmem:[%s2759_s27 + $0x228] sm:$0xff] %v607_v20  ;;  %840 = vrot.lane.b32.xlu1 %v2611_v24, %s2414_s28  ;;  %838 = vrot.lane.b32.xlu0 %v2614_v25, %s2414_s28 }
 0x10d   : > { %v536_v21 = vpop.permute.xlu1 %535  ;;  %v534_v58 = vpop.permute.xlu0 %533 }
 0x10e   : > { %v608_v22 = vsel %vm597_vm1, %v532_v56, %v534_v58  ;;  %v609_v59 = vsel %vm597_vm1, %v534_v58, %v536_v21  ;;  %v3103_v21 = vld [vmem:[%s2488_s22 + $0x68] sm:$0xff]  ;;  %v3106_v58 = vld [vmem:[%s2488_s22 + $0x60] sm:$0xff] }
 0x10f   : > { %672 = vst [vmem:[%s2759_s27 + $0x230] sm:$0xff] %v608_v22  ;;  %673 = vst [vmem:[%s2759_s27 + $0x238] sm:$0xff] %v609_v59  ;;  %844 = vrot.lane.b32.xlu1 %v2621_v26, %s2414_s28  ;;  %842 = vrot.lane.b32.xlu0 %v2624_v27, %s2414_s28 }
 0x111   : > { %v540_v23 = vpop.permute.xlu1 %539  ;;  %v538_v24 = vpop.permute.xlu0 %537 }
 0x112   : > { %v610_v25 = vsel %vm597_vm1, %v538_v24, %v540_v23  ;;  %v3115_v24 = vld [vmem:[%s2488_s22 + $0x78] sm:$0xff] }
 0x113   : > { %674 = vst [vmem:[%s2759_s27 + $0x320] sm:$0xff] %v610_v25  ;;  %848 = vrot.lane.b32.xlu1 %v2631_v28, %s2414_s28  ;;  %846 = vrot.lane.b32.xlu0 %v2634_v29, %s2414_s28  ;;  %v3118_v25 = vld [vmem:[%s2488_s22 + $0x70] sm:$0xff] }
 0x115   : > { %v544_v0 = vpop.permute.xlu1 %543  ;;  %v542_v60 = vpop.permute.xlu0 %541 }
 0x116   : > { %v611_v26 = vsel %vm597_vm1, %v540_v23, %v542_v60 }
 0x117   : > { %675 = vst [vmem:[%s2759_s27 + $0x328] sm:$0xff] %v611_v26  ;;  %852 = vrot.lane.b32.xlu1 %v2641_v30, %s2414_s28  ;;  %850 = vrot.lane.b32.xlu0 %v2644_v31, %s2414_s28 }
 0x119   : > { %v548_v27 = vpop.permute.xlu1 %547  ;;  %v546_v61 = vpop.permute.xlu0 %545 }
 0x11a   : > { %v612_v28 = vsel %vm597_vm1, %v544_v0, %v546_v61  ;;  %v613_v62 = vsel %vm597_vm1, %v546_v61, %v548_v27  ;;  %v3129_v61 = vld [vmem:[%s2488_s22 + $0x88] sm:$0xff] }
 0x11b   : > { %676 = vst [vmem:[%s2759_s27 + $0x330] sm:$0xff] %v612_v28  ;;  %677 = vst [vmem:[%s2759_s27 + $0x338] sm:$0xff] %v613_v62  ;;  %856 = vrot.lane.b32.xlu1 %v2651_v32, %s2414_s28  ;;  %854 = vrot.lane.b32.xlu0 %v2654_v33, %s2414_s28 }
 0x11c   : > { %v3132_v28 = vld [vmem:[%s2488_s22 + $0x80] sm:$0xff] }
 0x11d   : > { %v552_v29 = vpop.permute.xlu1 %551  ;;  %v550_v30 = vpop.permute.xlu0 %549 }
 0x11e   : > { %v614_v31 = vsel %vm597_vm1, %v550_v30, %v552_v29 }
 0x11f   : > { %678 = vst [vmem:[%s2759_s27 + $0x420] sm:$0xff] %v614_v31  ;;  %860 = vrot.lane.b32.xlu1 %v2661_v34, %s2414_s28  ;;  %858 = vrot.lane.b32.xlu0 %v2664_v35, %s2414_s28  ;;  %v3141_v31 = vld [vmem:[%s2488_s22 + $0x98] sm:$0xff] }
 0x121   : > { %v556_v6 = vpop.permute.xlu1 %555  ;;  %v554_v63 = vpop.permute.xlu0 %553 }
 0x122   : > { %v615_v32 = vsel %vm597_vm1, %v552_v29, %v554_v63 }
 0x123   : > { %679 = vst [vmem:[%s2759_s27 + $0x428] sm:$0xff] %v615_v32  ;;  %864 = vrot.lane.b32.xlu1 %v2671_v36, %s2414_s28  ;;  %862 = vrot.lane.b32.xlu0 %v2674_v37, %s2414_s28 }
 0x125   : > { %v560_v33 = vpop.permute.xlu1 %559  ;;  %v558_v7 = vpop.permute.xlu0 %557 }
 0x126   : > { %v616_v34 = vsel %vm597_vm1, %v556_v6, %v558_v7  ;;  %v617_v48 = vsel %vm597_vm1, %v558_v7, %v560_v33  ;;  %v3144_v6 = vld [vmem:[%s2488_s22 + $0x90] sm:$0xff]  ;;  %v3153_v7 = vld [vmem:[%s2488_s22 + $0xa8] sm:$0xff] }
 0x127   : > { %680 = vst [vmem:[%s2759_s27 + $0x430] sm:$0xff] %v616_v34  ;;  %681 = vst [vmem:[%s2759_s27 + $0x438] sm:$0xff] %v617_v48  ;;  %868 = vrot.lane.b32.xlu1 %v2681_v38, %s2414_s28  ;;  %866 = vrot.lane.b32.xlu0 %v2684_v39, %s2414_s28 }
 0x128   : > { %v3156_v34 = vld [vmem:[%s2488_s22 + $0xa0] sm:$0xff] }
 0x129   : > { %v564_v35 = vpop.permute.xlu1 %563  ;;  %v562_v36 = vpop.permute.xlu0 %561 }
 0x12a   : > { %v618_v37 = vsel %vm597_vm1, %v562_v36, %v564_v35 }
 0x12b   : > { %682 = vst [vmem:[%s2759_s27 + $0x520] sm:$0xff] %v618_v37  ;;  %872 = vrot.lane.b32.xlu1 %v2691_v40, %s2414_s28  ;;  %870 = vrot.lane.b32.xlu0 %v2694_v41, %s2414_s28 }
 0x12d   : > { %v568_v49 = vpop.permute.xlu1 %567  ;;  %v566_v8 = vpop.permute.xlu0 %565 }
 0x12e   : > { %v619_v38 = vsel %vm597_vm1, %v564_v35, %v566_v8  ;;  %v3170_v8 = vld [vmem:[%s2488_s22 + $0xb0] sm:$0xff] }
 0x12f   : > { %683 = vst [vmem:[%s2759_s27 + $0x528] sm:$0xff] %v619_v38  ;;  %876 = vrot.lane.b32.xlu1 %v2701_v42, %s2414_s28  ;;  %874 = vrot.lane.b32.xlu0 %v2704_v43, %s2414_s28 }
 0x131   : > { %v572_v39 = vpop.permute.xlu1 %571  ;;  %v570_v9 = vpop.permute.xlu0 %569 }
 0x132   : > { %v620_v40 = vsel %vm597_vm1, %v568_v49, %v570_v9  ;;  %v621_v50 = vsel %vm597_vm1, %v570_v9, %v572_v39  ;;  %v3167_v49 = vld [vmem:[%s2488_s22 + $0xb8] sm:$0xff] }
 0x133   : > { %684 = vst [vmem:[%s2759_s27 + $0x530] sm:$0xff] %v620_v40  ;;  %685 = vst [vmem:[%s2759_s27 + $0x538] sm:$0xff] %v621_v50  ;;  %880 = vrot.lane.b32.xlu1 %v2711_v44, %s2414_s28  ;;  %878 = vrot.lane.b32.xlu0 %v2714_v45, %s2414_s28 }
 0x134   : > { %v3048_v45 = vld [vmem:[%s2488_s22 + $0x10] sm:$0xff]  ;;  %v3179_v40 = vld [vmem:[%s2488_s22 + $0xc8] sm:$0xff]  ;;  %v3182_v50 = vld [vmem:[%s2488_s22 + $0xc0] sm:$0xff] }
 0x135   : > { %v576_v41 = vpop.permute.xlu1 %575  ;;  %v574_v42 = vpop.permute.xlu0 %573 }
 0x136   : > { %v622_v43 = vsel %vm597_vm1, %v574_v42, %v576_v41 }
 0x137   : > { %686 = vst [vmem:[%s2759_s27 + $0x620] sm:$0xff] %v622_v43  ;;  %884 = vrot.lane.b32.xlu1 %v2721_v46, %s2414_s28  ;;  %882 = vrot.lane.b32.xlu0 %v2724_v47, %s2414_s28 }
 0x139   : > { %v580_v10 = vpop.permute.xlu1 %579  ;;  %v578_v51 = vpop.permute.xlu0 %577 }
 0x13a   : > { %v623_v44 = vsel %vm597_vm1, %v576_v41, %v578_v51  ;;  %v3194_v51 = vld [vmem:[%s2488_s22 + $0xd0] sm:$0xff] }
 0x13b   : > { %687 = vst [vmem:[%s2759_s27 + $0x628] sm:$0xff] %v623_v44  ;;  %1081 = vrot.lane.b32.xlu1 %v2504_v3, %s2415_s29  ;;  %1079 = vrot.lane.b32.xlu0 %v2494_v1, %s2415_s29 }
 0x13d   : > { %v584_v46 = vpop.permute.xlu1 %583  ;;  %v582_v11 = vpop.permute.xlu0 %581 }
 0x13e   : > { %v624_v47 = vsel %vm597_vm1, %v580_v10, %v582_v11  ;;  %v625_v12 = vsel %vm597_vm1, %v582_v11, %v584_v46  ;;  %v3191_v10 = vld [vmem:[%s2488_s22 + $0xd8] sm:$0xff] }
 0x13f   : > { %688 = vst [vmem:[%s2759_s27 + $0x630] sm:$0xff] %v624_v47  ;;  %689 = vst [vmem:[%s2759_s27 + $0x638] sm:$0xff] %v625_v12  ;;  %1085 = vrot.lane.b32.xlu1 %v2501_v2, %s2415_s29  ;;  %1083 = vrot.lane.b32.xlu0 %v3048_v45, %s2415_s29 }
 0x140   : > { %v3068_v2 = vld [vmem:[%s2488_s22 + $0x30] sm:$0xff]  ;;  %v3205_v12 = vld [vmem:[%s2488_s22 + $0xe8] sm:$0xff] }
 0x141   : > { %v588_v1 = vpop.permute.xlu1 %587  ;;  %v586_v3 = vpop.permute.xlu0 %585 }
 0x142   : > { %v626_v13 = vsel %vm597_vm1, %v586_v3, %v588_v1 }
 0x143   : > { %690 = vst [vmem:[%s2759_s27 + $0x720] sm:$0xff] %v626_v13  ;;  %1089 = vrot.lane.b32.xlu1 %v2511_v4, %s2415_s29  ;;  %1087 = vrot.lane.b32.xlu0 %v2514_v5, %s2415_s29  ;;  %v3077_v4 = vld [vmem:[%s2488_s22 + $0x48] sm:$0xff] }
 0x144   : > { %v3080_v5 = vld [vmem:[%s2488_s22 + $0x40] sm:$0xff] }
 0x145   : > { %v592_v53 = vpop.permute.xlu1 %591  ;;  %v590_v14 = vpop.permute.xlu0 %589 }
 0x146   : > { %v627_v15 = vsel %vm597_vm1, %v588_v1, %v590_v14  ;;  %v3208_v1 = vld [vmem:[%s2488_s22 + $0xe0] sm:$0xff]  ;;  %v3217_v14 = vld [vmem:[%s2488_s22 + $0xf8] sm:$0xff] }
 0x147   : > { %691 = vst [vmem:[%s2759_s27 + $0x728] sm:$0xff] %v627_v15  ;;  %1093 = vrot.lane.b32.xlu1 %v3065_v52, %s2415_s29  ;;  %1091 = vrot.lane.b32.xlu0 %v3068_v2, %s2415_s29  ;;  %v3220_v15 = vld [vmem:[%s2488_s22 + $0xf0] sm:$0xff] }
 0x149   : > { %v596_v54 = vpop.permute.xlu1 %595  ;;  %v594_v16 = vpop.permute.xlu0 %593 }
 0x14a   : > { %v628_v55 = vsel %vm597_vm1, %v592_v53, %v594_v16  ;;  %v629_v17 = vsel %vm597_vm1, %v594_v16, %v596_v54 }
 0x14b   : > { %692 = vst [vmem:[%s2759_s27 + $0x730] sm:$0xff] %v628_v55  ;;  %693 = vst [vmem:[%s2759_s27 + $0x738] sm:$0xff] %v629_v17  ;;  %1097 = vrot.lane.b32.xlu1 %v3077_v4, %s2415_s29  ;;  %1095 = vrot.lane.b32.xlu0 %v3080_v5, %s2415_s29 }
 0x14c   : > { %v3229_v17 = vld [vmem:[%s2488_s22 + $0x108] sm:$0xff] }
 0x14d   : > { %v793_v56 = vpop.permute.xlu1 %792  ;;  %v791_v57 = vpop.permute.xlu0 %790 }
 0x14e   : > { %v887_v20 = vsel %vm886_vm2, %v791_v57, %v793_v56 }
 0x14f   : > { %951 = vst [vmem:[%s2759_s27 + $0x40] sm:$0xff] %v887_v20  ;;  %1101 = vrot.lane.b32.xlu1 %v3091_v18, %s2415_s29  ;;  %1099 = vrot.lane.b32.xlu0 %v3094_v19, %s2415_s29 }
 0x151   : > { %v797_v22 = vpop.permute.xlu1 %796  ;;  %v795_v59 = vpop.permute.xlu0 %794 }
 0x152   : > { %v888_v23 = vsel %vm886_vm2, %v793_v56, %v795_v59  ;;  %v3232_v56 = vld [vmem:[%s2488_s22 + $0x100] sm:$0xff] }
 0x153   : > { %952 = vst [vmem:[%s2759_s27 + $0x48] sm:$0xff] %v888_v23  ;;  %1105 = vrot.lane.b32.xlu1 %v3103_v21, %s2415_s29  ;;  %1103 = vrot.lane.b32.xlu0 %v3106_v58, %s2415_s29  ;;  %v3243_v23 = vld [vmem:[%s2488_s22 + $0x118] sm:$0xff] }
 0x155   : > { %v801_v0 = vpop.permute.xlu1 %800  ;;  %v799_v60 = vpop.permute.xlu0 %798 }
 0x156   : > { %v889_v26 = vsel %vm886_vm2, %v797_v22, %v799_v60  ;;  %v890_v27 = vsel %vm886_vm2, %v799_v60, %v801_v0  ;;  %v3246_v0 = vld [vmem:[%s2488_s22 + $0x110] sm:$0xff] }
 0x157   : > { %953 = vst [vmem:[%s2759_s27 + $0x50] sm:$0xff] %v889_v26  ;;  %954 = vst [vmem:[%s2759_s27 + $0x58] sm:$0xff] %v890_v27  ;;  %1109 = vrot.lane.b32.xlu1 %v3115_v24, %s2415_s29  ;;  %1107 = vrot.lane.b32.xlu0 %v3118_v25, %s2415_s29 }
 0x159   : > { %v805_v62 = vpop.permute.xlu1 %804  ;;  %v803_v29 = vpop.permute.xlu0 %802 }
 0x15a   : > { %v891_v30 = vsel %vm886_vm2, %v803_v29, %v805_v62  ;;  %v3258_v29 = vld [vmem:[%s2488_s22 + $0x120] sm:$0xff] }
 0x15b   : > { %955 = vst [vmem:[%s2759_s27 + $0x140] sm:$0xff] %v891_v30  ;;  %1113 = vrot.lane.b32.xlu1 %v3129_v61, %s2415_s29  ;;  %1111 = vrot.lane.b32.xlu0 %v3132_v28, %s2415_s29 }
 0x15d   : > { %v809_v63 = vpop.permute.xlu1 %808  ;;  %v807_v32 = vpop.permute.xlu0 %806 }
 0x15e   : > { %v892_v33 = vsel %vm886_vm2, %v805_v62, %v807_v32  ;;  %v3255_v62 = vld [vmem:[%s2488_s22 + $0x128] sm:$0xff] }
 0x15f   : > { %956 = vst [vmem:[%s2759_s27 + $0x148] sm:$0xff] %v892_v33  ;;  %1117 = vrot.lane.b32.xlu1 %v3141_v31, %s2415_s29  ;;  %1115 = vrot.lane.b32.xlu0 %v3144_v6, %s2415_s29  ;;  %v3267_v33 = vld [vmem:[%s2488_s22 + $0x138] sm:$0xff] }
 0x161   : > { %v813_v48 = vpop.permute.xlu1 %812  ;;  %v811_v35 = vpop.permute.xlu0 %810 }
 0x162   : > { %v893_v36 = vsel %vm886_vm2, %v809_v63, %v811_v35  ;;  %v894_v37 = vsel %vm886_vm2, %v811_v35, %v813_v48  ;;  %v3270_v48 = vld [vmem:[%s2488_s22 + $0x130] sm:$0xff] }
 0x163   : > { %957 = vst [vmem:[%s2759_s27 + $0x150] sm:$0xff] %v893_v36  ;;  %958 = vst [vmem:[%s2759_s27 + $0x158] sm:$0xff] %v894_v37  ;;  %1121 = vrot.lane.b32.xlu1 %v3153_v7, %s2415_s29  ;;  %1119 = vrot.lane.b32.xlu0 %v3156_v34, %s2415_s29 }
 0x165   : > { %v817_v38 = vpop.permute.xlu1 %816  ;;  %v815_v39 = vpop.permute.xlu0 %814 }
 0x166   : > { %v895_v9 = vsel %vm886_vm2, %v815_v39, %v817_v38  ;;  %v3281_v39 = vld [vmem:[%s2488_s22 + $0x148] sm:$0xff] }
 0x167   : > { %959 = vst [vmem:[%s2759_s27 + $0x240] sm:$0xff] %v895_v9  ;;  %1125 = vrot.lane.b32.xlu1 %v3167_v49, %s2415_s29  ;;  %1123 = vrot.lane.b32.xlu0 %v3170_v8, %s2415_s29  ;;  %v3284_v9 = vld [vmem:[%s2488_s22 + $0x140] sm:$0xff] }
 0x169   : > { %v821_v41 = vpop.permute.xlu1 %820  ;;  %v819_v42 = vpop.permute.xlu0 %818 }
 0x16a   : > { %v896_v43 = vsel %vm886_vm2, %v817_v38, %v819_v42 }
 0x16b   : > { %960 = vst [vmem:[%s2759_s27 + $0x248] sm:$0xff] %v896_v43  ;;  %1129 = vrot.lane.b32.xlu1 %v3179_v40, %s2415_s29  ;;  %1127 = vrot.lane.b32.xlu0 %v3182_v50, %s2415_s29 }
 0x16d   : > { %v825_v44 = vpop.permute.xlu1 %824  ;;  %v823_v46 = vpop.permute.xlu0 %822 }
 0x16e   : > { %v897_v11 = vsel %vm886_vm2, %v821_v41, %v823_v46  ;;  %v898_v47 = vsel %vm886_vm2, %v823_v46, %v825_v44  ;;  %v3293_v44 = vld [vmem:[%s2488_s22 + $0x158] sm:$0xff]  ;;  %v3296_v46 = vld [vmem:[%s2488_s22 + $0x150] sm:$0xff] }
 0x16f   : > { %961 = vst [vmem:[%s2759_s27 + $0x250] sm:$0xff] %v897_v11  ;;  %962 = vst [vmem:[%s2759_s27 + $0x258] sm:$0xff] %v898_v47  ;;  %1133 = vrot.lane.b32.xlu1 %v3191_v10, %s2415_s29  ;;  %1131 = vrot.lane.b32.xlu0 %v3194_v51, %s2415_s29 }
 0x171   : > { %v829_v3 = vpop.permute.xlu1 %828  ;;  %v827_v13 = vpop.permute.xlu0 %826 }
 0x172   : > { %v899_v53 = vsel %vm886_vm2, %v827_v13, %v829_v3  ;;  %v3305_v13 = vld [vmem:[%s2488_s22 + $0x168] sm:$0xff] }
 0x173   : > { %963 = vst [vmem:[%s2759_s27 + $0x340] sm:$0xff] %v899_v53  ;;  %1137 = vrot.lane.b32.xlu1 %v3205_v12, %s2415_s29  ;;  %1135 = vrot.lane.b32.xlu0 %v3208_v1, %s2415_s29  ;;  %v3308_v53 = vld [vmem:[%s2488_s22 + $0x160] sm:$0xff] }
 0x175   : > { %v833_v54 = vpop.permute.xlu1 %832  ;;  %v831_v16 = vpop.permute.xlu0 %830 }
 0x176   : > { %v900_v55 = vsel %vm886_vm2, %v829_v3, %v831_v16 }
 0x177   : > { %964 = vst [vmem:[%s2759_s27 + $0x348] sm:$0xff] %v900_v55  ;;  %1141 = vrot.lane.b32.xlu1 %v3217_v14, %s2415_s29  ;;  %1139 = vrot.lane.b32.xlu0 %v3220_v15, %s2415_s29 }
 0x179   : > { %v837_v57 = vpop.permute.xlu1 %836  ;;  %v835_v20 = vpop.permute.xlu0 %834 }
 0x17a   : > { %v901_v22 = vsel %vm886_vm2, %v833_v54, %v835_v20  ;;  %v902_v59 = vsel %vm886_vm2, %v835_v20, %v837_v57  ;;  %v3319_v20 = vld [vmem:[%s2488_s22 + $0x178] sm:$0xff] }
 0x17b   : > { %965 = vst [vmem:[%s2759_s27 + $0x350] sm:$0xff] %v901_v22  ;;  %966 = vst [vmem:[%s2759_s27 + $0x358] sm:$0xff] %v902_v59  ;;  %1145 = vrot.lane.b32.xlu1 %v3229_v17, %s2415_s29  ;;  %1143 = vrot.lane.b32.xlu0 %v3232_v56, %s2415_s29 }
 0x17c   : > { %v3322_v22 = vld [vmem:[%s2488_s22 + $0x170] sm:$0xff] }
 0x17d   : > { %v841_v60 = vpop.permute.xlu1 %840  ;;  %v839_v26 = vpop.permute.xlu0 %838 }
 0x17e   : > { %v903_v27 = vsel %vm886_vm2, %v839_v26, %v841_v60 }
 0x17f   : > { %967 = vst [vmem:[%s2759_s27 + $0x440] sm:$0xff] %v903_v27  ;;  %1149 = vrot.lane.b32.xlu1 %v3243_v23, %s2415_s29  ;;  %1147 = vrot.lane.b32.xlu0 %v3246_v0, %s2415_s29  ;;  %v3331_v27 = vld [vmem:[%s2488_s22 + $0x8] sm:$0xff] }
 0x181   : > { %v845_v30 = vpop.permute.xlu1 %844  ;;  %v843_v63 = vpop.permute.xlu0 %842 }
 0x182   : > { %v904_v32 = vsel %vm886_vm2, %v841_v60, %v843_v63 }
 0x183   : > { %968 = vst [vmem:[%s2759_s27 + $0x448] sm:$0xff] %v904_v32  ;;  %1153 = vrot.lane.b32.xlu1 %v3255_v62, %s2415_s29  ;;  %1151 = vrot.lane.b32.xlu0 %v3258_v29, %s2415_s29 }
 0x185   : > { %v849_v35 = vpop.permute.xlu1 %848  ;;  %v847_v36 = vpop.permute.xlu0 %846 }
 0x186   : > { %v905_v37 = vsel %vm886_vm2, %v845_v30, %v847_v36  ;;  %v906_v38 = vsel %vm886_vm2, %v847_v36, %v849_v35  ;;  %v3334_v30 = vld [vmem:[%s2488_s22] sm:$0xff]  ;;  %v3343_v36 = vld [vmem:[%s2488_s22 + $0x18] sm:$0xff] }
 0x187   : > { %969 = vst [vmem:[%s2759_s27 + $0x450] sm:$0xff] %v905_v37  ;;  %970 = vst [vmem:[%s2759_s27 + $0x458] sm:$0xff] %v906_v38  ;;  %1157 = vrot.lane.b32.xlu1 %v3267_v33, %s2415_s29  ;;  %1155 = vrot.lane.b32.xlu0 %v3270_v48, %s2415_s29 }
 0x189   : > { %v853_v41 = vpop.permute.xlu1 %852  ;;  %v851_v42 = vpop.permute.xlu0 %850 }
 0x18a   : > { %v907_v43 = vsel %vm886_vm2, %v851_v42, %v853_v41 }
 0x18b   : > { %971 = vst [vmem:[%s2759_s27 + $0x540] sm:$0xff] %v907_v43  ;;  %1161 = vrot.lane.b32.xlu1 %v3281_v39, %s2415_s29  ;;  %1159 = vrot.lane.b32.xlu0 %v3284_v9, %s2415_s29  ;;  %v3354_v43 = vld [vmem:[%s2488_s22 + $0x28] sm:$0xff] }
 0x18d   : > { %v857_v11 = vpop.permute.xlu1 %856  ;;  %v855_v47 = vpop.permute.xlu0 %854 }
 0x18e   : > { %v908_v3 = vsel %vm886_vm2, %v853_v41, %v855_v47 }
 0x18f   : > { %972 = vst [vmem:[%s2759_s27 + $0x548] sm:$0xff] %v908_v3  ;;  %1165 = vrot.lane.b32.xlu1 %v3293_v44, %s2415_s29  ;;  %1163 = vrot.lane.b32.xlu0 %v3296_v46, %s2415_s29 }
 0x191   : > { %v861_v54 = vpop.permute.xlu1 %860  ;;  %v859_v16 = vpop.permute.xlu0 %858 }
 0x192   : > { %v909_v55 = vsel %vm886_vm2, %v857_v11, %v859_v16  ;;  %v910_v57 = vsel %vm886_vm2, %v859_v16, %v861_v54  ;;  %v3357_v11 = vld [vmem:[%s2488_s22 + $0x20] sm:$0xff] }
 0x193   : > { %973 = vst [vmem:[%s2759_s27 + $0x550] sm:$0xff] %v909_v55  ;;  %974 = vst [vmem:[%s2759_s27 + $0x558] sm:$0xff] %v910_v57  ;;  %1169 = vrot.lane.b32.xlu1 %v3305_v13, %s2415_s29  ;;  %1167 = vrot.lane.b32.xlu0 %v3308_v53, %s2415_s29 }
 0x195   : > { %v865_v59 = vpop.permute.xlu1 %864  ;;  %v863_v60 = vpop.permute.xlu0 %862 }
 0x196   : > { %v911_v26 = vsel %vm886_vm2, %v863_v60, %v865_v59 }
 0x197   : > { %975 = vst [vmem:[%s2759_s27 + $0x640] sm:$0xff] %v911_v26  ;;  %1173 = vrot.lane.b32.xlu1 %v3319_v20, %s2415_s29  ;;  %1171 = vrot.lane.b32.xlu0 %v3322_v22, %s2415_s29 }
 0x199   : > { %v869_v63 = vpop.permute.xlu1 %868  ;;  %v867_v32 = vpop.permute.xlu0 %866 }
 0x19a   : > { %v912_v35 = vsel %vm886_vm2, %v865_v59, %v867_v32 }
 0x19b   : > { %976 = vst [vmem:[%s2759_s27 + $0x648] sm:$0xff] %v912_v35  ;;  %1370 = vrot.lane.b32.xlu1 %v3331_v27, %s2416_s30  ;;  %1368 = vrot.lane.b32.xlu0 %v3334_v30, %s2416_s30 }
 0x19d   : > { %v873_v37 = vpop.permute.xlu1 %872  ;;  %v871_v38 = vpop.permute.xlu0 %870 }
 0x19e   : > { %v913_v41 = vsel %vm886_vm2, %v869_v63, %v871_v38  ;;  %v914_v42 = vsel %vm886_vm2, %v871_v38, %v873_v37 }
 0x19f   : > { %977 = vst [vmem:[%s2759_s27 + $0x650] sm:$0xff] %v913_v41  ;;  %978 = vst [vmem:[%s2759_s27 + $0x658] sm:$0xff] %v914_v42  ;;  %1374 = vrot.lane.b32.xlu1 %v3343_v36, %s2416_s30  ;;  %1372 = vrot.lane.b32.xlu0 %v3048_v45, %s2416_s30 }
 0x1a1   : > { %v877_v47 = vpop.permute.xlu1 %876  ;;  %v875_v3 = vpop.permute.xlu0 %874 }
 0x1a2   : > { %v915_v54 = vsel %vm886_vm2, %v875_v3, %v877_v47 }
 0x1a3   : > { %979 = vst [vmem:[%s2759_s27 + $0x740] sm:$0xff] %v915_v54  ;;  %1378 = vrot.lane.b32.xlu1 %v3354_v43, %s2416_s30  ;;  %1376 = vrot.lane.b32.xlu0 %v3357_v11, %s2416_s30 }
 0x1a5   : > { %v881_v16 = vpop.permute.xlu1 %880  ;;  %v879_v55 = vpop.permute.xlu0 %878 }
 0x1a6   : > { %v916_v57 = vsel %vm886_vm2, %v877_v47, %v879_v55 }
 0x1a7   : > { %980 = vst [vmem:[%s2759_s27 + $0x748] sm:$0xff] %v916_v57  ;;  %1382 = vrot.lane.b32.xlu1 %v3065_v52, %s2416_s30  ;;  %1380 = vrot.lane.b32.xlu0 %v3068_v2, %s2416_s30 }
 0x1a9   : > { %v885_v59 = vpop.permute.xlu1 %884  ;;  %v883_v60 = vpop.permute.xlu0 %882 }
 0x1aa   : > { %v917_v26 = vsel %vm886_vm2, %v881_v16, %v883_v60  ;;  %v918_v63 = vsel %vm886_vm2, %v883_v60, %v885_v59 }
 0x1ab   : > { %981 = vst [vmem:[%s2759_s27 + $0x750] sm:$0xff] %v917_v26  ;;  %982 = vst [vmem:[%s2759_s27 + $0x758] sm:$0xff] %v918_v63  ;;  %1386 = vrot.lane.b32.xlu1 %v3077_v4, %s2416_s30  ;;  %1384 = vrot.lane.b32.xlu0 %v3080_v5, %s2416_s30 }
 0x1ad   : > { %v1082_v32 = vpop.permute.xlu1 %1081  ;;  %v1080_v35 = vpop.permute.xlu0 %1079 }
 0x1ae   : > { %v1176_v37 = vsel %vm1175_vm3, %v1080_v35, %v1082_v32 }
 0x1af   : > { %1240 = vst [vmem:[%s2759_s27 + $0x60] sm:$0xff] %v1176_v37  ;;  %1390 = vrot.lane.b32.xlu1 %v3091_v18, %s2416_s30  ;;  %1388 = vrot.lane.b32.xlu0 %v3094_v19, %s2416_s30 }
 0x1b1   : > { %v1086_v38 = vpop.permute.xlu1 %1085  ;;  %v1084_v41 = vpop.permute.xlu0 %1083 }
 0x1b2   : > { %v1177_v42 = vsel %vm1175_vm3, %v1082_v32, %v1084_v41 }
 0x1b3   : > { %1241 = vst [vmem:[%s2759_s27 + $0x68] sm:$0xff] %v1177_v42  ;;  %1394 = vrot.lane.b32.xlu1 %v3103_v21, %s2416_s30  ;;  %1392 = vrot.lane.b32.xlu0 %v3106_v58, %s2416_s30 }
 0x1b5   : > { %v1090_v47 = vpop.permute.xlu1 %1089  ;;  %v1088_v3 = vpop.permute.xlu0 %1087 }
 0x1b6   : > { %v1178_v54 = vsel %vm1175_vm3, %v1086_v38, %v1088_v3  ;;  %v1179_v16 = vsel %vm1175_vm3, %v1088_v3, %v1090_v47 }
 0x1b7   : > { %1242 = vst [vmem:[%s2759_s27 + $0x70] sm:$0xff] %v1178_v54  ;;  %1243 = vst [vmem:[%s2759_s27 + $0x78] sm:$0xff] %v1179_v16  ;;  %1398 = vrot.lane.b32.xlu1 %v3115_v24, %s2416_s30  ;;  %1396 = vrot.lane.b32.xlu0 %v3118_v25, %s2416_s30 }
 0x1b9   : > { %v1094_v55 = vpop.permute.xlu1 %1093  ;;  %v1092_v57 = vpop.permute.xlu0 %1091 }
 0x1ba   : > { %v1180_v59 = vsel %vm1175_vm3, %v1092_v57, %v1094_v55 }
 0x1bb   : > { %1244 = vst [vmem:[%s2759_s27 + $0x160] sm:$0xff] %v1180_v59  ;;  %1402 = vrot.lane.b32.xlu1 %v3129_v61, %s2416_s30  ;;  %1400 = vrot.lane.b32.xlu0 %v3132_v28, %s2416_s30 }
 0x1bd   : > { %v1098_v60 = vpop.permute.xlu1 %1097  ;;  %v1096_v26 = vpop.permute.xlu0 %1095 }
 0x1be   : > { %v1181_v63 = vsel %vm1175_vm3, %v1094_v55, %v1096_v26 }
 0x1bf   : > { %1245 = vst [vmem:[%s2759_s27 + $0x168] sm:$0xff] %v1181_v63  ;;  %1406 = vrot.lane.b32.xlu1 %v3141_v31, %s2416_s30  ;;  %1404 = vrot.lane.b32.xlu0 %v3144_v6, %s2416_s30 }
 0x1c1   : > { %v1102_v32 = vpop.permute.xlu1 %1101  ;;  %v1100_v35 = vpop.permute.xlu0 %1099 }
 0x1c2   : > { %v1182_v37 = vsel %vm1175_vm3, %v1098_v60, %v1100_v35  ;;  %v1183_v38 = vsel %vm1175_vm3, %v1100_v35, %v1102_v32 }
 0x1c3   : > { %1246 = vst [vmem:[%s2759_s27 + $0x170] sm:$0xff] %v1182_v37  ;;  %1247 = vst [vmem:[%s2759_s27 + $0x178] sm:$0xff] %v1183_v38  ;;  %1410 = vrot.lane.b32.xlu1 %v3153_v7, %s2416_s30  ;;  %1408 = vrot.lane.b32.xlu0 %v3156_v34, %s2416_s30 }
 0x1c5   : > { %v1106_v41 = vpop.permute.xlu1 %1105  ;;  %v1104_v42 = vpop.permute.xlu0 %1103 }
 0x1c6   : > { %v1184_v47 = vsel %vm1175_vm3, %v1104_v42, %v1106_v41 }
 0x1c7   : > { %1248 = vst [vmem:[%s2759_s27 + $0x260] sm:$0xff] %v1184_v47  ;;  %1414 = vrot.lane.b32.xlu1 %v3167_v49, %s2416_s30  ;;  %1412 = vrot.lane.b32.xlu0 %v3170_v8, %s2416_s30 }
 0x1c9   : > { %v1110_v3 = vpop.permute.xlu1 %1109  ;;  %v1108_v54 = vpop.permute.xlu0 %1107 }
 0x1ca   : > { %v1185_v16 = vsel %vm1175_vm3, %v1106_v41, %v1108_v54 }
 0x1cb   : > { %1249 = vst [vmem:[%s2759_s27 + $0x268] sm:$0xff] %v1185_v16  ;;  %1418 = vrot.lane.b32.xlu1 %v3179_v40, %s2416_s30  ;;  %1416 = vrot.lane.b32.xlu0 %v3182_v50, %s2416_s30 }
 0x1cd   : > { %v1114_v55 = vpop.permute.xlu1 %1113  ;;  %v1112_v57 = vpop.permute.xlu0 %1111 }
 0x1ce   : > { %v1186_v59 = vsel %vm1175_vm3, %v1110_v3, %v1112_v57  ;;  %v1187_v60 = vsel %vm1175_vm3, %v1112_v57, %v1114_v55 }
 0x1cf   : > { %1250 = vst [vmem:[%s2759_s27 + $0x270] sm:$0xff] %v1186_v59  ;;  %1251 = vst [vmem:[%s2759_s27 + $0x278] sm:$0xff] %v1187_v60  ;;  %1422 = vrot.lane.b32.xlu1 %v3191_v10, %s2416_s30  ;;  %1420 = vrot.lane.b32.xlu0 %v3194_v51, %s2416_s30 }
 0x1d1   : > { %v1118_v26 = vpop.permute.xlu1 %1117  ;;  %v1116_v63 = vpop.permute.xlu0 %1115 }
 0x1d2   : > { %v1188_v32 = vsel %vm1175_vm3, %v1116_v63, %v1118_v26 }
 0x1d3   : > { %1252 = vst [vmem:[%s2759_s27 + $0x360] sm:$0xff] %v1188_v32  ;;  %1426 = vrot.lane.b32.xlu1 %v3205_v12, %s2416_s30  ;;  %1424 = vrot.lane.b32.xlu0 %v3208_v1, %s2416_s30 }
 0x1d5   : > { %v1122_v35 = vpop.permute.xlu1 %1121  ;;  %v1120_v37 = vpop.permute.xlu0 %1119 }
 0x1d6   : > { %v1189_v38 = vsel %vm1175_vm3, %v1118_v26, %v1120_v37  ;;  %v3474_v37 = vld [vmem:[%s2488_s22 + $0x38] sm:$0xff] }
 0x1d7   : > { %1253 = vst [vmem:[%s2759_s27 + $0x368] sm:$0xff] %v1189_v38  ;;  %1430 = vrot.lane.b32.xlu1 %v3217_v14, %s2416_s30  ;;  %1428 = vrot.lane.b32.xlu0 %v3220_v15, %s2416_s30  ;;  %v3477_v38 = vld [vmem:[%s2488_s22 + $0x30] sm:$0xff] }
 0x1d8   : > { %2175 = vst [vmem:[%s2759_s27 + $0x1e0] sm:$0xff] %v3477_v38  ;;  %2176 = vst [vmem:[%s2759_s27 + $0x1e8] sm:$0xff] %v3474_v37 }
 0x1d9   : > { %v1126_v41 = vpop.permute.xlu1 %1125  ;;  %v1124_v42 = vpop.permute.xlu0 %1123 }
 0x1da   : > { %v1190_v47 = vsel %vm1175_vm3, %v1122_v35, %v1124_v42  ;;  %v1191_v3 = vsel %vm1175_vm3, %v1124_v42, %v1126_v41 }
 0x1db   : > { %1254 = vst [vmem:[%s2759_s27 + $0x370] sm:$0xff] %v1190_v47  ;;  %1255 = vst [vmem:[%s2759_s27 + $0x378] sm:$0xff] %v1191_v3  ;;  %1434 = vrot.lane.b32.xlu1 %v3229_v17, %s2416_s30  ;;  %1432 = vrot.lane.b32.xlu0 %v3232_v56, %s2416_s30 }
 0x1dc   : > { %v3491_v3 = vld [vmem:[%s2488_s22 + $0x48] sm:$0xff] }
 0x1dd   : > { %v1130_v54 = vpop.permute.xlu1 %1129  ;;  %v1128_v16 = vpop.permute.xlu0 %1127  ;;  %2177 = vst [vmem:[%s2759_s27 + $0x1f0] sm:$0xff] %v3491_v3 }
 0x1de   : > { %v1192_v55 = vsel %vm1175_vm3, %v1128_v16, %v1130_v54 }
 0x1df   : > { %1256 = vst [vmem:[%s2759_s27 + $0x460] sm:$0xff] %v1192_v55  ;;  %1438 = vrot.lane.b32.xlu1 %v3243_v23, %s2416_s30  ;;  %1436 = vrot.lane.b32.xlu0 %v3246_v0, %s2416_s30 }
 0x1e1   : > { %v1134_v57 = vpop.permute.xlu1 %1133  ;;  %v1132_v59 = vpop.permute.xlu0 %1131 }
 0x1e2   : > { %v1193_v60 = vsel %vm1175_vm3, %v1130_v54, %v1132_v59 }
 0x1e3   : > { %1257 = vst [vmem:[%s2759_s27 + $0x468] sm:$0xff] %v1193_v60  ;;  %1442 = vrot.lane.b32.xlu1 %v3255_v62, %s2416_s30  ;;  %1440 = vrot.lane.b32.xlu0 %v3258_v29, %s2416_s30 }
 0x1e5   : > { %v1138_v26 = vpop.permute.xlu1 %1137  ;;  %v1136_v63 = vpop.permute.xlu0 %1135 }
 0x1e6   : > { %v1194_v32 = vsel %vm1175_vm3, %v1134_v57, %v1136_v63  ;;  %v1195_v35 = vsel %vm1175_vm3, %v1136_v63, %v1138_v26  ;;  %v3502_v57 = vld [vmem:[%s2488_s22 + $0x50] sm:$0xff] }
 0x1e7   : > { %1258 = vst [vmem:[%s2759_s27 + $0x470] sm:$0xff] %v1194_v32  ;;  %1259 = vst [vmem:[%s2759_s27 + $0x478] sm:$0xff] %v1195_v35  ;;  %1446 = vrot.lane.b32.xlu1 %v3267_v33, %s2416_s30  ;;  %1444 = vrot.lane.b32.xlu0 %v3270_v48, %s2416_s30 }
 0x1e8   : > { %2178 = vst [vmem:[%s2759_s27 + $0x1f8] sm:$0xff] %v3502_v57  ;;  %v3514_v32 = vld [vmem:[%s2488_s22 + $0x68] sm:$0xff]  ;;  %v3517_v35 = vld [vmem:[%s2488_s22 + $0x60] sm:$0xff] }
 0x1e9   : > { %v1142_v41 = vpop.permute.xlu1 %1141  ;;  %v1140_v42 = vpop.permute.xlu0 %1139  ;;  %2179 = vst [vmem:[%s2759_s27 + $0x2e0] sm:$0xff] %v3517_v35  ;;  %2180 = vst [vmem:[%s2759_s27 + $0x2e8] sm:$0xff] %v3514_v32 }
 0x1ea   : > { %v1196_v47 = vsel %vm1175_vm3, %v1140_v42, %v1142_v41 }
 0x1eb   : > { %1260 = vst [vmem:[%s2759_s27 + $0x560] sm:$0xff] %v1196_v47  ;;  %1450 = vrot.lane.b32.xlu1 %v3281_v39, %s2416_s30  ;;  %1448 = vrot.lane.b32.xlu0 %v3284_v9, %s2416_s30 }
 0x1ed   : > { %v1146_v54 = vpop.permute.xlu1 %1145  ;;  %v1144_v16 = vpop.permute.xlu0 %1143 }
 0x1ee   : > { %v1197_v55 = vsel %vm1175_vm3, %v1142_v41, %v1144_v16 }
 0x1ef   : > { %1261 = vst [vmem:[%s2759_s27 + $0x568] sm:$0xff] %v1197_v55  ;;  %1454 = vrot.lane.b32.xlu1 %v3293_v44, %s2416_s30  ;;  %1452 = vrot.lane.b32.xlu0 %v3296_v46, %s2416_s30 }
 0x1f1   : > { %v1150_v59 = vpop.permute.xlu1 %1149  ;;  %v1148_v60 = vpop.permute.xlu0 %1147 }
 0x1f2   : > { %v1198_v26 = vsel %vm1175_vm3, %v1146_v54, %v1148_v60  ;;  %v1199_v63 = vsel %vm1175_vm3, %v1148_v60, %v1150_v59  ;;  %v3531_v54 = vld [vmem:[%s2488_s22 + $0x78] sm:$0xff]  ;;  %v3542_v60 = vld [vmem:[%s2488_s22 + $0x80] sm:$0xff] }
 0x1f3   : > { %1262 = vst [vmem:[%s2759_s27 + $0x570] sm:$0xff] %v1198_v26  ;;  %1263 = vst [vmem:[%s2759_s27 + $0x578] sm:$0xff] %v1199_v63  ;;  %1458 = vrot.lane.b32.xlu1 %v3305_v13, %s2416_s30  ;;  %1456 = vrot.lane.b32.xlu0 %v3308_v53, %s2416_s30 }
 0x1f4   : > { %2181 = vst [vmem:[%s2759_s27 + $0x2f0] sm:$0xff] %v3531_v54  ;;  %2182 = vst [vmem:[%s2759_s27 + $0x2f8] sm:$0xff] %v3542_v60 }
 0x1f5   : > { %v1154_v41 = vpop.permute.xlu1 %1153  ;;  %v1152_v42 = vpop.permute.xlu0 %1151 }
 0x1f6   : > { %v1200_v47 = vsel %vm1175_vm3, %v1152_v42, %v1154_v41 }
 0x1f7   : > { %1264 = vst [vmem:[%s2759_s27 + $0x660] sm:$0xff] %v1200_v47  ;;  %1462 = vrot.lane.b32.xlu1 %v3319_v20, %s2416_s30  ;;  %1460 = vrot.lane.b32.xlu0 %v3322_v22, %s2416_s30  ;;  %v3554_v47 = vld [vmem:[%s2488_s22 + $0x98] sm:$0xff] }
 0x1f8   : > { %2184 = vst [vmem:[%s2759_s27 + $0x3e8] sm:$0xff] %v3554_v47 }
 0x1f9   : > { %v1158_v16 = vpop.permute.xlu1 %1157  ;;  %v1156_v55 = vpop.permute.xlu0 %1155 }
 0x1fa   : > { %v1201_v59 = vsel %vm1175_vm3, %v1154_v41, %v1156_v55  ;;  %v3557_v55 = vld [vmem:[%s2488_s22 + $0x90] sm:$0xff] }
 0x1fb   : > { %1265 = vst [vmem:[%s2759_s27 + $0x668] sm:$0xff] %v1201_v59  ;;  %1659 = vrot.lane.b32.xlu1 %v3331_v27, %s2417_s2  ;;  %1657 = vrot.lane.b32.xlu0 %v3334_v30, %s2417_s2  ;;  %4095 = vst [vmem:[#allocation7_spill] sm:$0xff] %v3557_v55 }
 0x1fc   : > { %2183 = vst [vmem:[%s2759_s27 + $0x3e0] sm:$0xff] %v3557_v55 }
 0x1fd   : > { %v1162_v26 = vpop.permute.xlu1 %1161  ;;  %v1160_v63 = vpop.permute.xlu0 %1159 }
 0x1fe   : > { %v1202_v41 = vsel %vm1175_vm3, %v1158_v16, %v1160_v63  ;;  %v1203_v42 = vsel %vm1175_vm3, %v1160_v63, %v1162_v26  ;;  %v3571_v63 = vld [vmem:[%s2488_s22 + $0xa8] sm:$0xff] }
 0x1ff   : > { %1266 = vst [vmem:[%s2759_s27 + $0x670] sm:$0xff] %v1202_v41  ;;  %1267 = vst [vmem:[%s2759_s27 + $0x678] sm:$0xff] %v1203_v42  ;;  %1663 = vrot.lane.b32.xlu1 %v3343_v36, %s2417_s2  ;;  %1661 = vrot.lane.b32.xlu0 %v3048_v45, %s2417_s2 }
 0x200   : > { %4096 = vst [vmem:[#allocation8_spill] sm:$0xff] %v3571_v63  ;;  %2185 = vst [vmem:[%s2759_s27 + $0x3f0] sm:$0xff] %v3571_v63 }
 0x201   : > { %v1166_v16 = vpop.permute.xlu1 %1165  ;;  %v1164_v59 = vpop.permute.xlu0 %1163 }
 0x202   : > { %v1204_v26 = vsel %vm1175_vm3, %v1164_v59, %v1166_v16  ;;  %v3582_v59 = vld [vmem:[%s2488_s22 + $0xb0] sm:$0xff] }
 0x203   : > { %1268 = vst [vmem:[%s2759_s27 + $0x760] sm:$0xff] %v1204_v26  ;;  %1667 = vrot.lane.b32.xlu1 %v3354_v43, %s2417_s2  ;;  %1665 = vrot.lane.b32.xlu0 %v3357_v11, %s2417_s2  ;;  %2186 = vst [vmem:[%s2759_s27 + $0x3f8] sm:$0xff] %v3582_v59 }
 0x205   : > { %v1170_v45 = vpop.permute.xlu1 %1169  ;;  %v1168_v41 = vpop.permute.xlu0 %1167 }
 0x206   : > { %v1205_v42 = vsel %vm1175_vm3, %v1166_v16, %v1168_v41  ;;  %v3594_v41 = vld [vmem:[%s2488_s22 + $0xc8] sm:$0xff] }
 0x207   : > { %1269 = vst [vmem:[%s2759_s27 + $0x768] sm:$0xff] %v1205_v42  ;;  %1671 = vrot.lane.b32.xlu1 %v3065_v52, %s2417_s2  ;;  %1669 = vrot.lane.b32.xlu0 %v3068_v2, %s2417_s2  ;;  %v3597_v42 = vld [vmem:[%s2488_s22 + $0xc0] sm:$0xff] }
 0x208   : > { %2187 = vst [vmem:[%s2759_s27 + $0x4e0] sm:$0xff] %v3597_v42  ;;  %2188 = vst [vmem:[%s2759_s27 + $0x4e8] sm:$0xff] %v3594_v41 }
 0x209   : > { %v1174_v26 = vpop.permute.xlu1 %1173  ;;  %v1172_v63 = vpop.permute.xlu0 %1171 }
 0x20a   : > { %v1206_v55 = vsel %vm1175_vm3, %v1170_v45, %v1172_v63  ;;  %v1207_v16 = vsel %vm1175_vm3, %v1172_v63, %v1174_v26  ;;  %v3622_v26 = vld [vmem:[%s2488_s22 + $0xe0] sm:$0xff] }
 0x20b   : > { %1270 = vst [vmem:[%s2759_s27 + $0x770] sm:$0xff] %v1206_v55  ;;  %1271 = vst [vmem:[%s2759_s27 + $0x778] sm:$0xff] %v1207_v16  ;;  %1675 = vrot.lane.b32.xlu1 %v3077_v4, %s2417_s2  ;;  %1673 = vrot.lane.b32.xlu0 %v3080_v5, %s2417_s2 }
 0x20c   : > { %v3611_v55 = vld [vmem:[%s2488_s22 + $0xd8] sm:$0xff]  ;;  %2190 = vst [vmem:[%s2759_s27 + $0x4f8] sm:$0xff] %v3622_v26 }
 0x20d   : > { %v1371_v52 = vpop.permute.xlu1 %1370  ;;  %v1369_v2 = vpop.permute.xlu0 %1368  ;;  %2189 = vst [vmem:[%s2759_s27 + $0x4f0] sm:$0xff] %v3611_v55 }
 0x20e   : > { %v1465_v63 = vsel %vm1464_vm4, %v1369_v2, %v1371_v52  ;;  %v3634_v2 = vld [vmem:[%s2488_s22 + $0xf8] sm:$0xff] }
 0x20f   : > { %1529 = vst [vmem:[%s2759_s27 + $0x80] sm:$0xff] %v1465_v63  ;;  %1679 = vrot.lane.b32.xlu1 %v3091_v18, %s2417_s2  ;;  %1677 = vrot.lane.b32.xlu0 %v3094_v19, %s2417_s2  ;;  %v3637_v63 = vld [vmem:[%s2488_s22 + $0xf0] sm:$0xff] }
 0x210   : > { %2191 = vst [vmem:[%s2759_s27 + $0x5e0] sm:$0xff] %v3637_v63  ;;  %2192 = vst [vmem:[%s2759_s27 + $0x5e8] sm:$0xff] %v3634_v2 }
 0x211   : > { %v1375_v4 = vpop.permute.xlu1 %1374  ;;  %v1373_v5 = vpop.permute.xlu0 %1372 }
 0x212   : > { %v1466_v45 = vsel %vm1464_vm4, %v1371_v52, %v1373_v5  ;;  %v3651_v5 = vld [vmem:[%s2488_s22 + $0x108] sm:$0xff] }
 0x213   : > { %1530 = vst [vmem:[%s2759_s27 + $0x88] sm:$0xff] %v1466_v45  ;;  %1683 = vrot.lane.b32.xlu1 %v3103_v21, %s2417_s2  ;;  %1681 = vrot.lane.b32.xlu0 %v3106_v58, %s2417_s2  ;;  %2193 = vst [vmem:[%s2759_s27 + $0x5f0] sm:$0xff] %v3651_v5 }
 0x215   : > { %v1379_v18 = vpop.permute.xlu1 %1378  ;;  %v1377_v19 = vpop.permute.xlu0 %1376 }
 0x216   : > { %v1467_v16 = vsel %vm1464_vm4, %v1375_v4, %v1377_v19  ;;  %v1468_v52 = vsel %vm1464_vm4, %v1377_v19, %v1379_v18  ;;  %v3662_v18 = vld [vmem:[%s2488_s22 + $0x110] sm:$0xff] }
 0x217   : > { %1531 = vst [vmem:[%s2759_s27 + $0x90] sm:$0xff] %v1467_v16  ;;  %1532 = vst [vmem:[%s2759_s27 + $0x98] sm:$0xff] %v1468_v52  ;;  %1687 = vrot.lane.b32.xlu1 %v3115_v24, %s2417_s2  ;;  %1685 = vrot.lane.b32.xlu0 %v3118_v25, %s2417_s2 }
 0x218   : > { %2194 = vst [vmem:[%s2759_s27 + $0x5f8] sm:$0xff] %v3662_v18  ;;  %v3674_v52 = vld [vmem:[%s2488_s22 + $0x128] sm:$0xff] }
 0x219   : > { %v1383_v21 = vpop.permute.xlu1 %1382  ;;  %v1381_v58 = vpop.permute.xlu0 %1380  ;;  %2196 = vst [vmem:[%s2759_s27 + $0x6e8] sm:$0xff] %v3674_v52 }
 0x21a   : > { %v1469_v4 = vsel %vm1464_vm4, %v1381_v58, %v1383_v21 }
 0x21b   : > { %1533 = vst [vmem:[%s2759_s27 + $0x180] sm:$0xff] %v1469_v4  ;;  %1691 = vrot.lane.b32.xlu1 %v3129_v61, %s2417_s2  ;;  %1689 = vrot.lane.b32.xlu0 %v3132_v28, %s2417_s2  ;;  %v3691_v4 = vld [vmem:[%s2488_s22 + $0x138] sm:$0xff] }
 0x21c   : > { %2197 = vst [vmem:[%s2759_s27 + $0x6f0] sm:$0xff] %v3691_v4 }
 0x21d   : > { %v1387_v24 = vpop.permute.xlu1 %1386  ;;  %v1385_v25 = vpop.permute.xlu0 %1384 }
 0x21e   : > { %v1470_v45 = vsel %vm1464_vm4, %v1383_v21, %v1385_v25  ;;  %v3677_v21 = vld [vmem:[%s2488_s22 + $0x120] sm:$0xff] }
 0x21f   : > { %1534 = vst [vmem:[%s2759_s27 + $0x188] sm:$0xff] %v1470_v45  ;;  %1695 = vrot.lane.b32.xlu1 %v3141_v31, %s2417_s2  ;;  %1693 = vrot.lane.b32.xlu0 %v3144_v6, %s2417_s2  ;;  %2195 = vst [vmem:[%s2759_s27 + $0x6e0] sm:$0xff] %v3677_v21 }
 0x220   : > { %v3702_v25 = vld [vmem:[%s2488_s22 + $0x140] sm:$0xff] }
 0x221   : > { %v1391_v61 = vpop.permute.xlu1 %1390  ;;  %v1389_v28 = vpop.permute.xlu0 %1388  ;;  %2198 = vst [vmem:[%s2759_s27 + $0x6f8] sm:$0xff] %v3702_v25 }
 0x222   : > { %v1471_v19 = vsel %vm1464_vm4, %v1387_v24, %v1389_v28  ;;  %v1472_v16 = vsel %vm1464_vm4, %v1389_v28, %v1391_v61  ;;  %v3714_v28 = vld [vmem:[%s2488_s22 + $0x158] sm:$0xff] }
 0x223   : > { %1535 = vst [vmem:[%s2759_s27 + $0x190] sm:$0xff] %v1471_v19  ;;  %1536 = vst [vmem:[%s2759_s27 + $0x198] sm:$0xff] %v1472_v16  ;;  %1699 = vrot.lane.b32.xlu1 %v3153_v7, %s2417_s2  ;;  %1697 = vrot.lane.b32.xlu0 %v3156_v34, %s2417_s2 }
 0x224   : > { %v3717_v19 = vld [vmem:[%s2488_s22 + $0x150] sm:$0xff]  ;;  %2200 = vst [vmem:[%s2759_s27 + $0x7e8] sm:$0xff] %v3714_v28 }
 0x225   : > { %v1395_v31 = vpop.permute.xlu1 %1394  ;;  %v1393_v6 = vpop.permute.xlu0 %1392  ;;  %2199 = vst [vmem:[%s2759_s27 + $0x7e0] sm:$0xff] %v3717_v19 }
 0x226   : > { %v1473_v58 = vsel %vm1464_vm4, %v1393_v6, %v1395_v31 }
 0x227   : > { %1537 = vst [vmem:[%s2759_s27 + $0x280] sm:$0xff] %v1473_v58  ;;  %1703 = vrot.lane.b32.xlu1 %v3167_v49, %s2417_s2  ;;  %1701 = vrot.lane.b32.xlu0 %v3170_v8, %s2417_s2  ;;  %v3742_v58 = vld [vmem:[%s2488_s22 + $0x170] sm:$0xff] }
 0x228   : > { %2202 = vst [vmem:[%s2759_s27 + $0x7f8] sm:$0xff] %v3742_v58 }
 0x229   : > { %v1399_v7 = vpop.permute.xlu1 %1398  ;;  %v1397_v34 = vpop.permute.xlu0 %1396 }
 0x22a   : > { %v1474_v24 = vsel %vm1464_vm4, %v1395_v31, %v1397_v34  ;;  %v3731_v31 = vld [vmem:[%s2488_s22 + $0x168] sm:$0xff] }
 0x22b   : > { %1538 = vst [vmem:[%s2759_s27 + $0x288] sm:$0xff] %v1474_v24  ;;  %1707 = vrot.lane.b32.xlu1 %v3179_v40, %s2417_s2  ;;  %1705 = vrot.lane.b32.xlu0 %v3182_v50, %s2417_s2  ;;  %2201 = vst [vmem:[%s2759_s27 + $0x7f0] sm:$0xff] %v3731_v31 }
 0x22d   : > { %v1403_v49 = vpop.permute.xlu1 %1402  ;;  %v1401_v8 = vpop.permute.xlu0 %1400 }
 0x22e   : > { %v1475_v45 = vsel %vm1464_vm4, %v1399_v7, %v1401_v8  ;;  %v1476_v61 = vsel %vm1464_vm4, %v1401_v8, %v1403_v49 }
 0x22f   : > { %1539 = vst [vmem:[%s2759_s27 + $0x290] sm:$0xff] %v1475_v45  ;;  %1540 = vst [vmem:[%s2759_s27 + $0x298] sm:$0xff] %v1476_v61  ;;  %1711 = vrot.lane.b32.xlu1 %v3191_v10, %s2417_s2  ;;  %1709 = vrot.lane.b32.xlu0 %v3194_v51, %s2417_s2 }
 0x231   : > { %v1407_v40 = vpop.permute.xlu1 %1406  ;;  %v1405_v50 = vpop.permute.xlu0 %1404 }
 0x232   : > { %v1477_v16 = vsel %vm1464_vm4, %v1405_v50, %v1407_v40 }
 0x233   : > { %1541 = vst [vmem:[%s2759_s27 + $0x380] sm:$0xff] %v1477_v16  ;;  %1715 = vrot.lane.b32.xlu1 %v3205_v12, %s2417_s2  ;;  %1713 = vrot.lane.b32.xlu0 %v3208_v1, %s2417_s2 }
 0x235   : > { %v1411_v10 = vpop.permute.xlu1 %1410  ;;  %v1409_v51 = vpop.permute.xlu0 %1408 }
 0x236   : > { %v1478_v6 = vsel %vm1464_vm4, %v1407_v40, %v1409_v51 }
 0x237   : > { %1542 = vst [vmem:[%s2759_s27 + $0x388] sm:$0xff] %v1478_v6  ;;  %1719 = vrot.lane.b32.xlu1 %v3217_v14, %s2417_s2  ;;  %1717 = vrot.lane.b32.xlu0 %v3220_v15, %s2417_s2 }
 0x239   : > { %v1415_v12 = vpop.permute.xlu1 %1414  ;;  %v1413_v1 = vpop.permute.xlu0 %1412 }
 0x23a   : > { %v1479_v7 = vsel %vm1464_vm4, %v1411_v10, %v1413_v1  ;;  %v1480_v34 = vsel %vm1464_vm4, %v1413_v1, %v1415_v12 }
 0x23b   : > { %1543 = vst [vmem:[%s2759_s27 + $0x390] sm:$0xff] %v1479_v7  ;;  %1544 = vst [vmem:[%s2759_s27 + $0x398] sm:$0xff] %v1480_v34  ;;  %1723 = vrot.lane.b32.xlu1 %v3229_v17, %s2417_s2  ;;  %1721 = vrot.lane.b32.xlu0 %v3232_v56, %s2417_s2 }
 0x23d   : > { %v1419_v14 = vpop.permute.xlu1 %1418  ;;  %v1417_v15 = vpop.permute.xlu0 %1416 }
 0x23e   : > { %v1481_v24 = vsel %vm1464_vm4, %v1417_v15, %v1419_v14  ;;  %v1858_v15 = vld [vmem:[%s2488_s22 + $0x40] sm:$0xff] }
 0x23f   : > { %1545 = vst [vmem:[%s2759_s27 + $0x480] sm:$0xff] %v1481_v24  ;;  %1727 = vrot.lane.b32.xlu1 %v3243_v23, %s2417_s2  ;;  %1725 = vrot.lane.b32.xlu0 %v3246_v0, %s2417_s2 }
 0x241   : > { %v1423_v49 = vpop.permute.xlu1 %1422  ;;  %v1421_v8 = vpop.permute.xlu0 %1420 }
 0x242   : > { %v1482_v17 = vsel %vm1464_vm4, %v1419_v14, %v1421_v8 }
 0x243   : > { %1546 = vst [vmem:[%s2759_s27 + $0x488] sm:$0xff] %v1482_v17  ;;  %1731 = vrot.lane.b32.xlu1 %v3255_v62, %s2417_s2  ;;  %1729 = vrot.lane.b32.xlu0 %v3258_v29, %s2417_s2 }
 0x245   : > { %v1427_v56 = vpop.permute.xlu1 %1426  ;;  %v1425_v45 = vpop.permute.xlu0 %1424 }
 0x246   : > { %v1483_v23 = vsel %vm1464_vm4, %v1423_v49, %v1425_v45  ;;  %v1484_v61 = vsel %vm1464_vm4, %v1425_v45, %v1427_v56 }
 0x247   : > { %1547 = vst [vmem:[%s2759_s27 + $0x490] sm:$0xff] %v1483_v23  ;;  %1548 = vst [vmem:[%s2759_s27 + $0x498] sm:$0xff] %v1484_v61  ;;  %1735 = vrot.lane.b32.xlu1 %v3267_v33, %s2417_s2  ;;  %1733 = vrot.lane.b32.xlu0 %v3270_v48, %s2417_s2 }
 0x248   : > { %v1864_v23 = vld [vmem:[%s2488_s22 + $0x70] sm:$0xff] }
 0x249   : > { %v1431_v0 = vpop.permute.xlu1 %1430  ;;  %v1429_v62 = vpop.permute.xlu0 %1428 }
 0x24a   : > { %v1485_v29 = vsel %vm1464_vm4, %v1429_v62, %v1431_v0 }
 0x24b   : > { %1549 = vst [vmem:[%s2759_s27 + $0x580] sm:$0xff] %v1485_v29  ;;  %1739 = vrot.lane.b32.xlu1 %v3281_v39, %s2417_s2  ;;  %1737 = vrot.lane.b32.xlu0 %v3284_v9, %s2417_s2 }
 0x24d   : > { %v1435_v40 = vpop.permute.xlu1 %1434  ;;  %v1433_v50 = vpop.permute.xlu0 %1432 }
 0x24e   : > { %v1486_v33 = vsel %vm1464_vm4, %v1431_v0, %v1433_v50 }
 0x24f   : > { %1550 = vst [vmem:[%s2759_s27 + $0x588] sm:$0xff] %v1486_v33  ;;  %1743 = vrot.lane.b32.xlu1 %v3293_v44, %s2417_s2  ;;  %1741 = vrot.lane.b32.xlu0 %v3296_v46, %s2417_s2 }
 0x251   : > { %v1439_v48 = vpop.permute.xlu1 %1438  ;;  %v1437_v16 = vpop.permute.xlu0 %1436 }
 0x252   : > { %v1487_v39 = vsel %vm1464_vm4, %v1435_v40, %v1437_v16  ;;  %v1488_v10 = vsel %vm1464_vm4, %v1437_v16, %v1439_v48  ;;  %v4097_v48 = vld [vmem:[#allocation7_spill] sm:$0xff] }
 0x253   : > { %1551 = vst [vmem:[%s2759_s27 + $0x590] sm:$0xff] %v1487_v39  ;;  %1552 = vst [vmem:[%s2759_s27 + $0x598] sm:$0xff] %v1488_v10  ;;  %1747 = vrot.lane.b32.xlu1 %v3305_v13, %s2417_s2  ;;  %1745 = vrot.lane.b32.xlu0 %v3308_v53, %s2417_s2 }
 0x254   : > { %v1852_v53 = vld [vmem:[%s2488_s22 + $0x10] sm:$0xff]  ;;  %v1870_v16 = vld [vmem:[%s2488_s22 + $0xa0] sm:$0xff] }
 0x255   : > { %v1443_v9 = vpop.permute.xlu1 %1442  ;;  %v1441_v44 = vpop.permute.xlu0 %1440 }
 0x256   : > { %v1489_v46 = vsel %vm1464_vm4, %v1441_v44, %v1443_v9  ;;  %v4098_v44 = vld [vmem:[#allocation8_spill] sm:$0xff] }
 0x257   : > { %1553 = vst [vmem:[%s2759_s27 + $0x680] sm:$0xff] %v1489_v46  ;;  %1751 = vrot.lane.b32.xlu1 %v3319_v20, %s2417_s2  ;;  %1749 = vrot.lane.b32.xlu0 %v3322_v22, %s2417_s2 }
 0x259   : > { %v1447_v51 = vpop.permute.xlu1 %1446  ;;  %v1445_v6 = vpop.permute.xlu0 %1444 }
 0x25a   : > { %v1490_v13 = vsel %vm1464_vm4, %v1443_v9, %v1445_v6 }
 0x25b   : > { %1554 = vst [vmem:[%s2759_s27 + $0x688] sm:$0xff] %v1490_v13  ;;  %1948 = vrot.lane.b32.xlu1 %v3331_v27, %s2418_s3  ;;  %1946 = vrot.lane.b32.xlu0 %v3334_v30, %s2418_s3 }
 0x25d   : > { %v1451_v12 = vpop.permute.xlu1 %1450  ;;  %v1449_v1 = vpop.permute.xlu0 %1448 }
 0x25e   : > { %v1491_v20 = vsel %vm1464_vm4, %v1447_v51, %v1449_v1  ;;  %v1492_v22 = vsel %vm1464_vm4, %v1449_v1, %v1451_v12  ;;  %v1876_v1 = vld [vmem:[%s2488_s22 + $0xd0] sm:$0xff] }
 0x25f   : > { %1555 = vst [vmem:[%s2759_s27 + $0x690] sm:$0xff] %v1491_v20  ;;  %1556 = vst [vmem:[%s2759_s27 + $0x698] sm:$0xff] %v1492_v22  ;;  %1952 = vrot.lane.b32.xlu1 %v3343_v36, %s2418_s3  ;;  %1950 = vrot.lane.b32.xlu0 %v1852_v53, %s2418_s3 }
 0x261   : > { %v1455_v27 = vpop.permute.xlu1 %1454  ;;  %v1453_v7 = vpop.permute.xlu0 %1452 }
 0x262   : > { %v1493_v30 = vsel %vm1464_vm4, %v1453_v7, %v1455_v27 }
 0x263   : > { %1557 = vst [vmem:[%s2759_s27 + $0x780] sm:$0xff] %v1493_v30  ;;  %1956 = vrot.lane.b32.xlu1 %v3354_v43, %s2418_s3  ;;  %1954 = vrot.lane.b32.xlu0 %v3357_v11, %s2418_s3 }
 0x265   : > { %v1459_v34 = vpop.permute.xlu1 %1458  ;;  %v1457_v14 = vpop.permute.xlu0 %1456 }
 0x266   : > { %v1494_v36 = vsel %vm1464_vm4, %v1455_v27, %v1457_v14 }
 0x267   : > { %1558 = vst [vmem:[%s2759_s27 + $0x788] sm:$0xff] %v1494_v36  ;;  %1960 = vrot.lane.b32.xlu1 %v3474_v37, %s2418_s3  ;;  %1958 = vrot.lane.b32.xlu0 %v3477_v38, %s2418_s3  ;;  %v1861_v37 = vld [vmem:[%s2488_s22 + $0x58] sm:$0xff] }
 0x268   : > { %v1882_v36 = vld [vmem:[%s2488_s22 + $0x100] sm:$0xff] }
 0x269   : > { %v1463_v24 = vpop.permute.xlu1 %1462  ;;  %v1461_v49 = vpop.permute.xlu0 %1460 }
 0x26a   : > { %v1495_v43 = vsel %vm1464_vm4, %v1459_v34, %v1461_v49  ;;  %v1496_v11 = vsel %vm1464_vm4, %v1461_v49, %v1463_v24 }
 0x26b   : > { %1559 = vst [vmem:[%s2759_s27 + $0x790] sm:$0xff] %v1495_v43  ;;  %1560 = vst [vmem:[%s2759_s27 + $0x798] sm:$0xff] %v1496_v11  ;;  %1964 = vrot.lane.b32.xlu1 %v3491_v3, %s2418_s3  ;;  %1962 = vrot.lane.b32.xlu0 %v1858_v15, %s2418_s3 }
 0x26d   : > { %v1660_v8 = vpop.permute.xlu1 %1659  ;;  %v1658_v38 = vpop.permute.xlu0 %1657 }
 0x26e   : > { %v1754_v17 = vsel %vm1753_vm5, %v1658_v38, %v1660_v8  ;;  %v1888_v38 = vld [vmem:[%s2488_s22 + $0x130] sm:$0xff] }
 0x26f   : > { %1818 = vst [vmem:[%s2759_s27 + $0xa0] sm:$0xff] %v1754_v17  ;;  %1968 = vrot.lane.b32.xlu1 %v1861_v37, %s2418_s3  ;;  %1966 = vrot.lane.b32.xlu0 %v3502_v57, %s2418_s3 }
 0x271   : > { %v1664_v56 = vpop.permute.xlu1 %1663  ;;  %v1662_v3 = vpop.permute.xlu0 %1661 }
 0x272   : > { %v1755_v45 = vsel %vm1753_vm5, %v1660_v8, %v1662_v3 }
 0x273   : > { %1819 = vst [vmem:[%s2759_s27 + $0xa8] sm:$0xff] %v1755_v45  ;;  %1972 = vrot.lane.b32.xlu1 %v3514_v32, %s2418_s3  ;;  %1970 = vrot.lane.b32.xlu0 %v3517_v35, %s2418_s3  ;;  %v1867_v32 = vld [vmem:[%s2488_s22 + $0x88] sm:$0xff] }
 0x275   : > { %v1668_v61 = vpop.permute.xlu1 %1667  ;;  %v1666_v0 = vpop.permute.xlu0 %1665 }
 0x276   : > { %v1756_v62 = vsel %vm1753_vm5, %v1664_v56, %v1666_v0  ;;  %v1757_v57 = vsel %vm1753_vm5, %v1666_v0, %v1668_v61  ;;  %v2139_v61 = vld [vmem:[%s2488_s22] sm:$0xff]  ;;  %v2140_v0 = vld [vmem:[%s2488_s22 + $0x8] sm:$0xff] }
 0x277   : > { %1820 = vst [vmem:[%s2759_s27 + $0xb0] sm:$0xff] %v1756_v62  ;;  %1821 = vst [vmem:[%s2759_s27 + $0xb8] sm:$0xff] %v1757_v57  ;;  %1976 = vrot.lane.b32.xlu1 %v3531_v54, %s2418_s3  ;;  %1974 = vrot.lane.b32.xlu0 %v1864_v23, %s2418_s3 }
 0x278   : > { %v2141_v62 = vld [vmem:[%s2488_s22 + $0x18] sm:$0xff]  ;;  %2171 = vst [vmem:[%s2759_s27 + $0xe0] sm:$0xff] %v2139_v61  ;;  %2172 = vst [vmem:[%s2759_s27 + $0xe8] sm:$0xff] %v2140_v0 }
 0x279   : > { %v1672_v29 = vpop.permute.xlu1 %1671  ;;  %v1670_v40 = vpop.permute.xlu0 %1669  ;;  %2173 = vst [vmem:[%s2759_s27 + $0xf0] sm:$0xff] %v2141_v62 }
 0x27a   : > { %v1758_v35 = vsel %vm1753_vm5, %v1670_v40, %v1672_v29 }
 0x27b   : > { %1822 = vst [vmem:[%s2759_s27 + $0x1a0] sm:$0xff] %v1758_v35  ;;  %1980 = vrot.lane.b32.xlu1 %v1867_v32, %s2418_s3  ;;  %1978 = vrot.lane.b32.xlu0 %v3542_v60, %s2418_s3 }
 0x27d   : > { %v1676_v50 = vpop.permute.xlu1 %1675  ;;  %v1674_v33 = vpop.permute.xlu0 %1673 }
 0x27e   : > { %v1759_v54 = vsel %vm1753_vm5, %v1672_v29, %v1674_v33 }
 0x27f   : > { %1823 = vst [vmem:[%s2759_s27 + $0x1a8] sm:$0xff] %v1759_v54  ;;  %1984 = vrot.lane.b32.xlu1 %v3554_v47, %s2418_s3  ;;  %1982 = vrot.lane.b32.xlu0 %v4097_v48, %s2418_s3  ;;  %v1873_v47 = vld [vmem:[%s2488_s22 + $0xb8] sm:$0xff] }
 0x281   : > { %v1680_v39 = vpop.permute.xlu1 %1679  ;;  %v1678_v10 = vpop.permute.xlu0 %1677 }
 0x282   : > { %v1760_v9 = vsel %vm1753_vm5, %v1676_v50, %v1678_v10  ;;  %v1761_v60 = vsel %vm1753_vm5, %v1678_v10, %v1680_v39 }
 0x283   : > { %1824 = vst [vmem:[%s2759_s27 + $0x1b0] sm:$0xff] %v1760_v9  ;;  %1825 = vst [vmem:[%s2759_s27 + $0x1b8] sm:$0xff] %v1761_v60  ;;  %1988 = vrot.lane.b32.xlu1 %v4098_v44, %s2418_s3  ;;  %1986 = vrot.lane.b32.xlu0 %v1870_v16, %s2418_s3 }
 0x285   : > { %v1684_v46 = vpop.permute.xlu1 %1683  ;;  %v1682_v51 = vpop.permute.xlu0 %1681 }
 0x286   : > { %v1762_v6 = vsel %vm1753_vm5, %v1682_v51, %v1684_v46 }
 0x287   : > { %1826 = vst [vmem:[%s2759_s27 + $0x2a0] sm:$0xff] %v1762_v6  ;;  %1992 = vrot.lane.b32.xlu1 %v1873_v47, %s2418_s3  ;;  %1990 = vrot.lane.b32.xlu0 %v3582_v59, %s2418_s3 }
 0x289   : > { %v1688_v13 = vpop.permute.xlu1 %1687  ;;  %v1686_v53 = vpop.permute.xlu0 %1685 }
 0x28a   : > { %v1763_v12 = vsel %vm1753_vm5, %v1684_v46, %v1686_v53 }
 0x28b   : > { %1827 = vst [vmem:[%s2759_s27 + $0x2a8] sm:$0xff] %v1763_v12  ;;  %1996 = vrot.lane.b32.xlu1 %v3594_v41, %s2418_s3  ;;  %1994 = vrot.lane.b32.xlu0 %v3597_v42, %s2418_s3  ;;  %v1879_v41 = vld [vmem:[%s2488_s22 + $0xe8] sm:$0xff] }
 0x28d   : > { %v1692_v20 = vpop.permute.xlu1 %1691  ;;  %v1690_v22 = vpop.permute.xlu0 %1689 }
 0x28e   : > { %v1764_v27 = vsel %vm1753_vm5, %v1688_v13, %v1690_v22  ;;  %v1765_v59 = vsel %vm1753_vm5, %v1690_v22, %v1692_v20 }
 0x28f   : > { %1828 = vst [vmem:[%s2759_s27 + $0x2b0] sm:$0xff] %v1764_v27  ;;  %1829 = vst [vmem:[%s2759_s27 + $0x2b8] sm:$0xff] %v1765_v59  ;;  %2000 = vrot.lane.b32.xlu1 %v3611_v55, %s2418_s3  ;;  %1998 = vrot.lane.b32.xlu0 %v1876_v1, %s2418_s3 }
 0x291   : > { %v1696_v7 = vpop.permute.xlu1 %1695  ;;  %v1694_v30 = vpop.permute.xlu0 %1693 }
 0x292   : > { %v1766_v42 = vsel %vm1753_vm5, %v1694_v30, %v1696_v7 }
 0x293   : > { %1830 = vst [vmem:[%s2759_s27 + $0x3a0] sm:$0xff] %v1766_v42  ;;  %2004 = vrot.lane.b32.xlu1 %v1879_v41, %s2418_s3  ;;  %2002 = vrot.lane.b32.xlu0 %v3622_v26, %s2418_s3 }
 0x295   : > { %v1700_v34 = vpop.permute.xlu1 %1699  ;;  %v1698_v14 = vpop.permute.xlu0 %1697 }
 0x296   : > { %v1767_v55 = vsel %vm1753_vm5, %v1696_v7, %v1698_v14 }
 0x297   : > { %1831 = vst [vmem:[%s2759_s27 + $0x3a8] sm:$0xff] %v1767_v55  ;;  %2008 = vrot.lane.b32.xlu1 %v3634_v2, %s2418_s3  ;;  %2006 = vrot.lane.b32.xlu0 %v3637_v63, %s2418_s3  ;;  %v1885_v2 = vld [vmem:[%s2488_s22 + $0x118] sm:$0xff] }
 0x299   : > { %v1704_v15 = vpop.permute.xlu1 %1703  ;;  %v1702_v24 = vpop.permute.xlu0 %1701 }
 0x29a   : > { %v1768_v49 = vsel %vm1753_vm5, %v1700_v34, %v1702_v24  ;;  %v1769_v26 = vsel %vm1753_vm5, %v1702_v24, %v1704_v15 }
 0x29b   : > { %1832 = vst [vmem:[%s2759_s27 + $0x3b0] sm:$0xff] %v1768_v49  ;;  %1833 = vst [vmem:[%s2759_s27 + $0x3b8] sm:$0xff] %v1769_v26  ;;  %2012 = vrot.lane.b32.xlu1 %v3651_v5, %s2418_s3  ;;  %2010 = vrot.lane.b32.xlu0 %v1882_v36, %s2418_s3 }
 0x29d   : > { %v1708_v43 = vpop.permute.xlu1 %1707  ;;  %v1706_v11 = vpop.permute.xlu0 %1705 }
 0x29e   : > { %v1770_v63 = vsel %vm1753_vm5, %v1706_v11, %v1708_v43 }
 0x29f   : > { %1834 = vst [vmem:[%s2759_s27 + $0x4a0] sm:$0xff] %v1770_v63  ;;  %2016 = vrot.lane.b32.xlu1 %v1885_v2, %s2418_s3  ;;  %2014 = vrot.lane.b32.xlu0 %v3662_v18, %s2418_s3 }
 0x2a1   : > { %v1712_v37 = vpop.permute.xlu1 %1711  ;;  %v1710_v8 = vpop.permute.xlu0 %1709 }
 0x2a2   : > { %v1771_v5 = vsel %vm1753_vm5, %v1708_v43, %v1710_v8 }
 0x2a3   : > { %1835 = vst [vmem:[%s2759_s27 + $0x4a8] sm:$0xff] %v1771_v5  ;;  %2020 = vrot.lane.b32.xlu1 %v3674_v52, %s2418_s3  ;;  %2018 = vrot.lane.b32.xlu0 %v3677_v21, %s2418_s3  ;;  %v1891_v52 = vld [vmem:[%s2488_s22 + $0x148] sm:$0xff] }
 0x2a5   : > { %v1716_v17 = vpop.permute.xlu1 %1715  ;;  %v1714_v56 = vpop.permute.xlu0 %1713 }
 0x2a6   : > { %v1772_v18 = vsel %vm1753_vm5, %v1712_v37, %v1714_v56  ;;  %v1773_v3 = vsel %vm1753_vm5, %v1714_v56, %v1716_v17 }
 0x2a7   : > { %1836 = vst [vmem:[%s2759_s27 + $0x4b0] sm:$0xff] %v1772_v18  ;;  %1837 = vst [vmem:[%s2759_s27 + $0x4b8] sm:$0xff] %v1773_v3  ;;  %2024 = vrot.lane.b32.xlu1 %v3691_v4, %s2418_s3  ;;  %2022 = vrot.lane.b32.xlu0 %v1888_v38, %s2418_s3 }
 0x2a8   : > { %v2142_v4 = vld [vmem:[%s2488_s22 + $0x20] sm:$0xff] }
 0x2a9   : > { %v1720_v21 = vpop.permute.xlu1 %1719  ;;  %v1718_v45 = vpop.permute.xlu0 %1717  ;;  %2174 = vst [vmem:[%s2759_s27 + $0xf8] sm:$0xff] %v2142_v4 }
 0x2aa   : > { %v1774_v23 = vsel %vm1753_vm5, %v1718_v45, %v1720_v21 }
 0x2ab   : > { %1838 = vst [vmem:[%s2759_s27 + $0x5a0] sm:$0xff] %v1774_v23  ;;  %2028 = vrot.lane.b32.xlu1 %v1891_v52, %s2418_s3  ;;  %2026 = vrot.lane.b32.xlu0 %v3702_v25, %s2418_s3  ;;  %v1894_v25 = vld [vmem:[%s2488_s22 + $0x160] sm:$0xff] }
 0x2ad   : > { %v1724_v57 = vpop.permute.xlu1 %1723  ;;  %v1722_v32 = vpop.permute.xlu0 %1721 }
 0x2ae   : > { %v1775_v29 = vsel %vm1753_vm5, %v1720_v21, %v1722_v32 }
 0x2af   : > { %1839 = vst [vmem:[%s2759_s27 + $0x5a8] sm:$0xff] %v1775_v29  ;;  %2032 = vrot.lane.b32.xlu1 %v3714_v28, %s2418_s3  ;;  %2030 = vrot.lane.b32.xlu0 %v3717_v19, %s2418_s3  ;;  %v1897_v28 = vld [vmem:[%s2488_s22 + $0x178] sm:$0xff] }
 0x2b1   : > { %v1728_v40 = vpop.permute.xlu1 %1727  ;;  %v1726_v35 = vpop.permute.xlu0 %1725 }
 0x2b2   : > { %v1776_v50 = vsel %vm1753_vm5, %v1724_v57, %v1726_v35  ;;  %v1777_v33 = vsel %vm1753_vm5, %v1726_v35, %v1728_v40 }
 0x2b3   : > { %1840 = vst [vmem:[%s2759_s27 + $0x5b0] sm:$0xff] %v1776_v50  ;;  %1841 = vst [vmem:[%s2759_s27 + $0x5b8] sm:$0xff] %v1777_v33  ;;  %2036 = vrot.lane.b32.xlu1 %v3731_v31, %s2418_s3  ;;  %2034 = vrot.lane.b32.xlu0 %v1894_v25, %s2418_s3 }
 0x2b5   : > { %v1732_v54 = vpop.permute.xlu1 %1731  ;;  %v1730_v19 = vpop.permute.xlu0 %1729 }
 0x2b6   : > { %v1778_v48 = vsel %vm1753_vm5, %v1730_v19, %v1732_v54 }
 0x2b7   : > { %1842 = vst [vmem:[%s2759_s27 + $0x6a0] sm:$0xff] %v1778_v48  ;;  %2040 = vrot.lane.b32.xlu1 %v1897_v28, %s2418_s3  ;;  %2038 = vrot.lane.b32.xlu0 %v3742_v58, %s2418_s3 }
 0x2b9   : > { %v1736_v16 = vpop.permute.xlu1 %1735  ;;  %v1734_v39 = vpop.permute.xlu0 %1733 }
 0x2ba   : > { %v1779_v31 = vsel %vm1753_vm5, %v1732_v54, %v1734_v39 }
 0x2bb   : > { %1843 = vst [vmem:[%s2759_s27 + $0x6a8] sm:$0xff] %v1779_v31 }
 0x2bd   : > { %v1740_v10 = vpop.permute.xlu1 %1739  ;;  %v1738_v9 = vpop.permute.xlu0 %1737 }
 0x2be   : > { %v1780_v60 = vsel %vm1753_vm5, %v1736_v16, %v1738_v9  ;;  %v1781_v44 = vsel %vm1753_vm5, %v1738_v9, %v1740_v10 }
 0x2bf   : > { %1844 = vst [vmem:[%s2759_s27 + $0x6b0] sm:$0xff] %v1780_v60  ;;  %1845 = vst [vmem:[%s2759_s27 + $0x6b8] sm:$0xff] %v1781_v44 }
 0x2c1   : > { %v1744_v47 = vpop.permute.xlu1 %1743  ;;  %v1742_v46 = vpop.permute.xlu0 %1741 }
 0x2c2   : > { %v1782_v58 = vsel %vm1753_vm5, %v1742_v46, %v1744_v47 }
 0x2c3   : > { %1846 = vst [vmem:[%s2759_s27 + $0x7a0] sm:$0xff] %v1782_v58 }
 0x2c5   : > { %v1748_v51 = vpop.permute.xlu1 %1747  ;;  %v1746_v6 = vpop.permute.xlu0 %1745 }
 0x2c6   : > { %v1783_v13 = vsel %vm1753_vm5, %v1744_v47, %v1746_v6 }
 0x2c7   : > { %1847 = vst [vmem:[%s2759_s27 + $0x7a8] sm:$0xff] %v1783_v13 }
 0x2c9   : > { %v1752_v53 = vpop.permute.xlu1 %1751  ;;  %v1750_v12 = vpop.permute.xlu0 %1749 }
 0x2ca   : > { %v1784_v1 = vsel %vm1753_vm5, %v1748_v51, %v1750_v12  ;;  %v1785_v20 = vsel %vm1753_vm5, %v1750_v12, %v1752_v53 }
 0x2cb   : > { %1848 = vst [vmem:[%s2759_s27 + $0x7b0] sm:$0xff] %v1784_v1  ;;  %1849 = vst [vmem:[%s2759_s27 + $0x7b8] sm:$0xff] %v1785_v20 }
 0x2cd   : > { %v1949_v22 = vpop.permute.xlu1 %1948  ;;  %v1947_v27 = vpop.permute.xlu0 %1946 }
 0x2ce   : > { %v2043_v59 = vsel %vm2042_vm6, %v1947_v27, %v1949_v22 }
 0x2cf   : > { %2107 = vst [vmem:[%s2759_s27 + $0xc0] sm:$0xff] %v2043_v59 }
 0x2d1   : > { %v1953_v41 = vpop.permute.xlu1 %1952  ;;  %v1951_v7 = vpop.permute.xlu0 %1950 }
 0x2d2   : > { %v2044_v30 = vsel %vm2042_vm6, %v1949_v22, %v1951_v7 }
 0x2d3   : > { %2108 = vst [vmem:[%s2759_s27 + $0xc8] sm:$0xff] %v2044_v30 }
 0x2d5   : > { %v1957_v42 = vpop.permute.xlu1 %1956  ;;  %v1955_v34 = vpop.permute.xlu0 %1954 }
 0x2d6   : > { %v2045_v14 = vsel %vm2042_vm6, %v1953_v41, %v1955_v34  ;;  %v2046_v55 = vsel %vm2042_vm6, %v1955_v34, %v1957_v42 }
 0x2d7   : > { %2109 = vst [vmem:[%s2759_s27 + $0xd0] sm:$0xff] %v2045_v14  ;;  %2110 = vst [vmem:[%s2759_s27 + $0xd8] sm:$0xff] %v2046_v55 }
 0x2d9   : > { %v1961_v36 = vpop.permute.xlu1 %1960  ;;  %v1959_v15 = vpop.permute.xlu0 %1958 }
 0x2da   : > { %v2047_v24 = vsel %vm2042_vm6, %v1959_v15, %v1961_v36 }
 0x2db   : > { %2111 = vst [vmem:[%s2759_s27 + $0x1c0] sm:$0xff] %v2047_v24 }
 0x2dd   : > { %v1965_v49 = vpop.permute.xlu1 %1964  ;;  %v1963_v26 = vpop.permute.xlu0 %1962 }
 0x2de   : > { %v2048_v2 = vsel %vm2042_vm6, %v1961_v36, %v1963_v26 }
 0x2df   : > { %2112 = vst [vmem:[%s2759_s27 + $0x1c8] sm:$0xff] %v2048_v2 }
 0x2e1   : > { %v1969_v43 = vpop.permute.xlu1 %1968  ;;  %v1967_v11 = vpop.permute.xlu0 %1966 }
 0x2e2   : > { %v2049_v63 = vsel %vm2042_vm6, %v1965_v49, %v1967_v11  ;;  %v2050_v37 = vsel %vm2042_vm6, %v1967_v11, %v1969_v43 }
 0x2e3   : > { %2113 = vst [vmem:[%s2759_s27 + $0x1d0] sm:$0xff] %v2049_v63  ;;  %2114 = vst [vmem:[%s2759_s27 + $0x1d8] sm:$0xff] %v2050_v37 }
 0x2e5   : > { %v1973_v8 = vpop.permute.xlu1 %1972  ;;  %v1971_v5 = vpop.permute.xlu0 %1970 }
 0x2e6   : > { %v2051_v38 = vsel %vm2042_vm6, %v1971_v5, %v1973_v8 }
 0x2e7   : > { %2115 = vst [vmem:[%s2759_s27 + $0x2c0] sm:$0xff] %v2051_v38 }
 0x2e9   : > { %v1977_v17 = vpop.permute.xlu1 %1976  ;;  %v1975_v56 = vpop.permute.xlu0 %1974 }
 0x2ea   : > { %v2052_v18 = vsel %vm2042_vm6, %v1973_v8, %v1975_v56 }
 0x2eb   : > { %2116 = vst [vmem:[%s2759_s27 + $0x2c8] sm:$0xff] %v2052_v18 }
 0x2ed   : > { %v1981_v3 = vpop.permute.xlu1 %1980  ;;  %v1979_v52 = vpop.permute.xlu0 %1978 }
 0x2ee   : > { %v2053_v21 = vsel %vm2042_vm6, %v1977_v17, %v1979_v52  ;;  %v2054_v45 = vsel %vm2042_vm6, %v1979_v52, %v1981_v3 }
 0x2ef   : > { %2117 = vst [vmem:[%s2759_s27 + $0x2d0] sm:$0xff] %v2053_v21  ;;  %2118 = vst [vmem:[%s2759_s27 + $0x2d8] sm:$0xff] %v2054_v45 }
 0x2f1   : > { %v1985_v23 = vpop.permute.xlu1 %1984  ;;  %v1983_v61 = vpop.permute.xlu0 %1982 }
 0x2f2   : > { %v2055_v0 = vsel %vm2042_vm6, %v1983_v61, %v1985_v23 }
 0x2f3   : > { %2119 = vst [vmem:[%s2759_s27 + $0x3c0] sm:$0xff] %v2055_v0 }
 0x2f5   : > { %v1989_v62 = vpop.permute.xlu1 %1988  ;;  %v1987_v4 = vpop.permute.xlu0 %1986 }
 0x2f6   : > { %v2056_v57 = vsel %vm2042_vm6, %v1985_v23, %v1987_v4 }
 0x2f7   : > { %2120 = vst [vmem:[%s2759_s27 + $0x3c8] sm:$0xff] %v2056_v57 }
 0x2f9   : > { %v1993_v32 = vpop.permute.xlu1 %1992  ;;  %v1991_v29 = vpop.permute.xlu0 %1990 }
 0x2fa   : > { %v2057_v25 = vsel %vm2042_vm6, %v1989_v62, %v1991_v29  ;;  %v2058_v40 = vsel %vm2042_vm6, %v1991_v29, %v1993_v32 }
 0x2fb   : > { %2121 = vst [vmem:[%s2759_s27 + $0x3d0] sm:$0xff] %v2057_v25  ;;  %2122 = vst [vmem:[%s2759_s27 + $0x3d8] sm:$0xff] %v2058_v40 }
 0x2fd   : > { %v1997_v35 = vpop.permute.xlu1 %1996  ;;  %v1995_v50 = vpop.permute.xlu0 %1994 }
 0x2fe   : > { %v2059_v33 = vsel %vm2042_vm6, %v1995_v50, %v1997_v35 }
 0x2ff   : > { %2123 = vst [vmem:[%s2759_s27 + $0x4c0] sm:$0xff] %v2059_v33 }
 0x301   : > { %v2001_v28 = vpop.permute.xlu1 %2000  ;;  %v1999_v54 = vpop.permute.xlu0 %1998 }
 0x302   : > { %v2060_v19 = vsel %vm2042_vm6, %v1997_v35, %v1999_v54 }
 0x303   : > { %2124 = vst [vmem:[%s2759_s27 + $0x4c8] sm:$0xff] %v2060_v19 }
 0x305   : > { %v2005_v48 = vpop.permute.xlu1 %2004  ;;  %v2003_v16 = vpop.permute.xlu0 %2002 }
 0x306   : > { %v2061_v39 = vsel %vm2042_vm6, %v2001_v28, %v2003_v16  ;;  %v2062_v31 = vsel %vm2042_vm6, %v2003_v16, %v2005_v48 }
 0x307   : > { %2125 = vst [vmem:[%s2759_s27 + $0x4d0] sm:$0xff] %v2061_v39  ;;  %2126 = vst [vmem:[%s2759_s27 + $0x4d8] sm:$0xff] %v2062_v31 }
 0x309   : > { %v2009_v10 = vpop.permute.xlu1 %2008  ;;  %v2007_v9 = vpop.permute.xlu0 %2006 }
 0x30a   : > { %v2063_v60 = vsel %vm2042_vm6, %v2007_v9, %v2009_v10 }
 0x30b   : > { %2127 = vst [vmem:[%s2759_s27 + $0x5c0] sm:$0xff] %v2063_v60 }
 0x30d   : > { %v2013_v44 = vpop.permute.xlu1 %2012  ;;  %v2011_v47 = vpop.permute.xlu0 %2010 }
 0x30e   : > { %v2064_v46 = vsel %vm2042_vm6, %v2009_v10, %v2011_v47 }
 0x30f   : > { %2128 = vst [vmem:[%s2759_s27 + $0x5c8] sm:$0xff] %v2064_v46 }
 0x311   : > { %v2017_v58 = vpop.permute.xlu1 %2016  ;;  %v2015_v51 = vpop.permute.xlu0 %2014 }
 0x312   : > { %v2065_v6 = vsel %vm2042_vm6, %v2013_v44, %v2015_v51  ;;  %v2066_v13 = vsel %vm2042_vm6, %v2015_v51, %v2017_v58 }
 0x313   : > { %2129 = vst [vmem:[%s2759_s27 + $0x5d0] sm:$0xff] %v2065_v6  ;;  %2130 = vst [vmem:[%s2759_s27 + $0x5d8] sm:$0xff] %v2066_v13 }
 0x315   : > { %v2021_v53 = vpop.permute.xlu1 %2020  ;;  %v2019_v12 = vpop.permute.xlu0 %2018 }
 0x316   : > { %v2067_v1 = vsel %vm2042_vm6, %v2019_v12, %v2021_v53 }
 0x317   : > { %2131 = vst [vmem:[%s2759_s27 + $0x6c0] sm:$0xff] %v2067_v1 }
 0x319   : > { %v2025_v20 = vpop.permute.xlu1 %2024  ;;  %v2023_v22 = vpop.permute.xlu0 %2022 }
 0x31a   : > { %v2068_v27 = vsel %vm2042_vm6, %v2021_v53, %v2023_v22 }
 0x31b   : > { %2132 = vst [vmem:[%s2759_s27 + $0x6c8] sm:$0xff] %v2068_v27 }
 0x31d   : > { %v2029_v59 = vpop.permute.xlu1 %2028  ;;  %v2027_v41 = vpop.permute.xlu0 %2026 }
 0x31e   : > { %v2069_v7 = vsel %vm2042_vm6, %v2025_v20, %v2027_v41  ;;  %v2070_v30 = vsel %vm2042_vm6, %v2027_v41, %v2029_v59 }
 0x31f   : > { %2133 = vst [vmem:[%s2759_s27 + $0x6d0] sm:$0xff] %v2069_v7  ;;  %2134 = vst [vmem:[%s2759_s27 + $0x6d8] sm:$0xff] %v2070_v30 }
 0x321   : > { %v2033_v42 = vpop.permute.xlu1 %2032  ;;  %v2031_v34 = vpop.permute.xlu0 %2030 }
 0x322   : > { %v2071_v14 = vsel %vm2042_vm6, %v2031_v34, %v2033_v42 }
 0x323   : > { %2135 = vst [vmem:[%s2759_s27 + $0x7c0] sm:$0xff] %v2071_v14 }
 0x325   : > { %v2037_v55 = vpop.permute.xlu1 %2036  ;;  %v2035_v36 = vpop.permute.xlu0 %2034 }
 0x326   : > { %v2072_v15 = vsel %vm2042_vm6, %v2033_v42, %v2035_v36 }
 0x327   : > { %2136 = vst [vmem:[%s2759_s27 + $0x7c8] sm:$0xff] %v2072_v15 }
 0x329   : > { %v2041_v24 = vpop.permute.xlu1 %2040  ;;  %v2039_v49 = vpop.permute.xlu0 %2038 }
 0x32a   : > { %v2073_v26 = vsel %vm2042_vm6, %v2037_v55, %v2039_v49  ;;  %v2074_v2 = vsel %vm2042_vm6, %v2039_v49, %v2041_v24 }
 0x32b   : > { %2137 = vst [vmem:[%s2759_s27 + $0x7d0] sm:$0xff] %v2073_v26  ;;  %2138 = vst [vmem:[%s2759_s27 + $0x7d8] sm:$0xff] %v2074_v2 }
 0x32c   : > { %s2316_s5 = sshll.u32 %s2456_s10, 12  ;;  %s2228_s11 = sshll.u32 %s2759_s27, 4  ;;  %s2229_s11 = int_to_ptr.vmem [resolvable:$true] %s2228_s11 }
 0x32d   : > { %s2217_s18 = scalar_lea.hbm %s4090_s1, %s2316_s5  ;;  %s2419_s19 = smov 4096  }
 0x32e   : > { %2318 = sst [smem:[#allocation5]] (%p2473_p5), %s2419_s19  ;;  %s2420_s20 = smov 8192  }
 0x32f   : > { %2319 = sst [smem:[#allocation5 + $0x1]] (%p2473_p5), %s2420_s20  ;;  %s2421_s21 = smov 16  }
 0x330   : > { %2320 = sst [smem:[#allocation5 + $0x2]] (%p2473_p5), %s2421_s21  ;;  %s2422_s22 = smov 256  }
 0x331   : > { %2321 = sst [smem:[#allocation5 + $0x3]] (%p2473_p5), %s2422_s22  ;;  %s2423_s10 = smov 131072  }
 0x332   : > { %2322 = sst [smem:[#allocation5 + $0x4]] (%p2473_p5), %s2422_s22  ;;  %s2424_s23 = smov 0  }
 0x333   : > { %2323 = sst [smem:[#allocation5 + $0x5]] (%p2473_p5), %s2421_s21 }
 0x334   : > { %2324 = dma.general (%p2473_p5), %s2229_s11, 32768, %s2217_s18, %s2204_s4, %s2423_s10, [#allocation5], %s2424_s23, 0  }
 0x335 PF: > { %p2330_p11 = scmp.ge.s32.totalorder %s2410_s9, 2  ;;  %s2256_s24 = sand.u32 1, %s2398_s6  }
 0x336   : > { %s2257_s25 = scalar_lea.sflag [#allocation3], %s2256_s24 }
 0x337   : > { %p2327_p12 = pnand %p2330_p11, %p2477_p6 }
 0x339   : > { %p2328_p13 = pneg %p2327_p12 }
 0x33b   : > { %2393 = dma.done.wait (%p2328_p13), %s2257_s25, 32768  }
 0x33c   : > { %2395 = vsyncadd (%p2328_p13), %s2257_s25, 4294934528  ;;  %p11_p0 = scmp.ge.s32.totalorder %s2460_s12, 4   ;;  %s4099_s6 = smov %s2402_s7 }
 0x33d   : > { %s4100_s7 = smov %s2406_s8  ;;  %s4101_s8 = smov %s2471_s15 }
 0x33e   : > { %s4102_s9 = smov %s2460_s12  ;;  %13 = sbr.rel (!%p11_p0) target bundleno = 3 (0x3), region = 64 }
 0x343   :  { %2262 = vsyncpa [#allocation3], 1 }
 0x344   :  { %2264 = vsyncpa [#allocation3 + $0x1], 1 }

</bundles_post_ra>
